<compile_context>
chip_gen: v6e
topology: v6e:2x2x1
jax: 0.10.0
libtpu: 0.0.40
codegen_flags: <defaults>
</compile_context>

<pallas_src>
import functools

import jax
import jax.numpy as jnp
from jax.experimental import pallas as pl
from jax.experimental.pallas import tpu as pltpu

EPS = 1e-5
VMEM_LIMIT = 64 * 1024 * 1024  # fits v5e/v6e (128 MiB) and v7x (64 MiB) budgets


def _tile(dim, target, aligns=(128, 8)):
    """Largest tile <= target that divides dim and is a multiple of an allowed
    alignment; the full dim if dim <= target (full-dim blocks are always legal)."""
    if dim <= target:
        return dim
    for align in aligns:
        t = (target // align) * align
        while t >= align:
            if dim % t == 0:
                return t
            t -= align
    # TODO(synk): pad + mask (pl.cdiv grids) instead of this full-dim fallback
    # for awkward, non-8/128-divisible realistic shapes.
    return dim


# ----------------------------- Pallas kernels ------------------------------ #

def layernorm_kernel(x_ref, g_ref, b_ref, o_ref):
    x = x_ref[...].astype(jnp.float32)                        # (tm, D)
    mean = jnp.mean(x, axis=-1, keepdims=True)
    var = jnp.mean(jnp.square(x - mean), axis=-1, keepdims=True)
    y = (x - mean) * jax.lax.rsqrt(var + EPS) * g_ref[...] + b_ref[...]
    o_ref[...] = y.astype(o_ref.dtype)


def ln_matmul_kernel(x_ref, g_ref, b_ref, w_ref, bias_ref, o_ref, xn_ref, *,
                     activation):
    # Fused pre-LayerNorm + projection (+ optional GELU).  LN (f32, VPU/EUP)
    # runs once per row block (j == 0) into a bf16 scratch and is reused for
    # every N tile, so the steady state is pure bf16 MXU work.
    @pl.when(pl.program_id(1) == 0)
    def _():
        x = x_ref[...].astype(jnp.float32)                    # (tm, D)
        mean = jnp.mean(x, axis=-1, keepdims=True)
        var = jnp.mean(jnp.square(x - mean), axis=-1, keepdims=True)
        xn = (x - mean) * jax.lax.rsqrt(var + EPS) * g_ref[...] + b_ref[...]
        xn_ref[...] = xn.astype(xn_ref.dtype)                 # bf16

    y = jnp.dot(xn_ref[...], w_ref[...],
                preferred_element_type=jnp.float32)           # bf16 x bf16 -> f32
    y = y + bias_ref[...]
    if activation == "gelu":
        # TODO(synk): tanh GELU assumed; switch to approximate=False (erf) or
        # ReLU if the reference Transformer uses those.
        y = jax.nn.gelu(y, approximate=True)
    o_ref[...] = y.astype(o_ref.dtype)


def matmul_residual_kernel(x_ref, w_ref, bias_ref, r_ref, o_ref):
    # K-tiled matmul; the f32 output block is resident across the k axis, so
    # accumulate directly into o_ref (no scratch) with bias + residual fused
    # into the k == 0 init.
    @pl.when(pl.program_id(2) == 0)
    def _():
        o_ref[...] = r_ref[...] + bias_ref[...]

    o_ref[...] += jnp.dot(x_ref[...], w_ref[...],
                          preferred_element_type=jnp.float32)


def flash_attn_kernel(q_ref, k_ref, v_ref, wo_ref, bo_ref, r_ref, o_ref,
                      m_ref, l_ref, acc_ref, *, heads, scale, split_qkv):
    # Flash-style online softmax over kv tiles; all heads handled with batched
    # einsums (bf16 MXU operands, f32 accumulation).  Epilogue fuses the W_o
    # projection, bias and residual, writing a lane-dense (tq, D) block.
    kv = pl.program_id(2)
    D = wo_ref.shape[0]
    dh = D // heads
    tq = q_ref.shape[1]
    tk = k_ref.shape[1]

    @pl.when(kv == 0)
    def _():
        m_ref[...] = jnp.full_like(m_ref, -jnp.inf)
        l_ref[...] = jnp.zeros_like(l_ref)
        acc_ref[...] = jnp.zeros_like(acc_ref)

    if split_qkv:
        q, k, v = q_ref[0], k_ref[0], v_ref[0]                # (t, D) bf16
    else:
        # TODO(synk): D not a multiple of 128 -> blocks carry all 3*D columns;
        # pad Dh to a 128-lane multiple for a fully head-major layout.
        q = q_ref[0][:, 0 * D:1 * D]
        k = k_ref[0][:, 1 * D:2 * D]
        v = v_ref[0][:, 2 * D:3 * D]

    q = q.reshape(tq, heads, dh)
    k = k.reshape(tk, heads, dh)
    v = v.reshape(tk, heads, dh)

    s = jnp.einsum("qhd,khd->hqk", q, k,
                   preferred_element_type=jnp.float32) * scale  # (H, tq, tk) f32
    m_prev = m_ref[...]
    m_new = jnp.maximum(m_prev, s.max(axis=-1, keepdims=True))
    alpha = jnp.exp(m_prev - m_new)
    p = jnp.exp(s - m_new)
    l_ref[...] = alpha * l_ref[...] + p.sum(axis=-1, keepdims=True)
    acc_ref[...] = alpha * acc_ref[...] + jnp.einsum(
        "hqk,khd->hqd", p.astype(v.dtype), v,
        preferred_element_type=jnp.float32)
    m_ref[...] = m_new

    @pl.when(kv == pl.num_programs(2) - 1)
    def _():
        o = acc_ref[...] * pl.reciprocal(l_ref[...], approx=True)   # (H, tq, dh)
        o2d = jnp.concatenate([o[h] for h in range(heads)], axis=-1)  # (tq, D)
        y = jnp.dot(o2d.astype(wo_ref.dtype), wo_ref[...],
                    preferred_element_type=jnp.float32)
        y = y + bo_ref[...] + r_ref[0].astype(jnp.float32)
        o_ref[0] = y.astype(o_ref.dtype)


# ------------------------------ kernel wrappers ----------------------------- #

def layernorm(x2d, g, b, *, tm=512):
    M, D = x2d.shape
    tm = _tile(M, tm)
    return pl.pallas_call(
        layernorm_kernel,
        out_shape=jax.ShapeDtypeStruct((M, D), x2d.dtype),
        grid=(M // tm,),
        in_specs=[pl.BlockSpec((tm, D), lambda i: (i, 0)),
                  pl.BlockSpec((1, D), lambda i: (0, 0)),
                  pl.BlockSpec((1, D), lambda i: (0, 0))],
        out_specs=pl.BlockSpec((tm, D), lambda i: (i, 0)),
        compiler_params=pltpu.CompilerParams(
            dimension_semantics=("parallel",),
            vmem_limit_bytes=VMEM_LIMIT),
    )(x2d, g.reshape(1, D), b.reshape(1, D))


def ln_matmul(x2d, g, b, w, bias, activation=None, out_dtype=None, *,
              tm=512, tn=512):
    """Fused LayerNorm(x) @ w + bias (+ GELU), LN hoisted out of the N loop."""
    M, D = x2d.shape
    N = w.shape[1]
    tm = _tile(M, tm)
    tn = _tile(N, tn, aligns=(128,))
    out_dtype = out_dtype or x2d.dtype
    kern = functools.partial(ln_matmul_kernel, activation=activation)
    return pl.pallas_call(
        kern,
        out_shape=jax.ShapeDtypeStruct((M, N), out_dtype),
        grid=(M // tm, N // tn),
        in_specs=[pl.BlockSpec((tm, D), lambda i, j: (i, 0)),
                  pl.BlockSpec((1, D), lambda i, j: (0, 0)),
                  pl.BlockSpec((1, D), lambda i, j: (0, 0)),
                  pl.BlockSpec((D, tn), lambda i, j: (0, j)),
                  pl.BlockSpec((1, tn), lambda i, j: (0, j))],
        out_specs=pl.BlockSpec((tm, tn), lambda i, j: (i, j)),
        scratch_shapes=[pltpu.VMEM((tm, D), jnp.bfloat16)],
        compiler_params=pltpu.CompilerParams(
            # j must stay sequential so the LN scratch written at j == 0 is
            # valid for every N tile of the same row block.
            dimension_semantics=("parallel", "arbitrary"),
            vmem_limit_bytes=VMEM_LIMIT),
    )(x2d, g.reshape(1, D), b.reshape(1, D), w, bias.reshape(1, N))


def matmul_residual(x2d, w, bias, residual, *, tm=512, tn=512, tk=512):
    """residual + bias + x @ w, K-tiled, accumulating in the f32 output block."""
    M, K = x2d.shape
    N = w.shape[1]
    tm = _tile(M, tm)
    tn = _tile(N, tn, aligns=(128,))
    tk = _tile(K, tk, aligns=(128,))
    return pl.pallas_call(
        matmul_residual_kernel,
        out_shape=jax.ShapeDtypeStruct((M, N), residual.dtype),
        grid=(M // tm, N // tn, K // tk),
        in_specs=[pl.BlockSpec((tm, tk), lambda i, j, k: (i, k)),
                  pl.BlockSpec((tk, tn), lambda i, j, k: (k, j)),
                  pl.BlockSpec((1, tn), lambda i, j, k: (0, j)),
                  pl.BlockSpec((tm, tn), lambda i, j, k: (i, j))],
        out_specs=pl.BlockSpec((tm, tn), lambda i, j, k: (i, j)),
        compiler_params=pltpu.CompilerParams(
            dimension_semantics=("parallel", "parallel", "arbitrary"),
            vmem_limit_bytes=VMEM_LIMIT),
    )(x2d, w, bias.reshape(1, N), residual)


def flash_attention(qkv, wo, bo, residual, heads, *, tq=256, tk=512):
    """qkv: (B, S, 3D) bf16 fused slab -> residual + MHA(qkv) @ W_o + b_o."""
    B, S, D3 = qkv.shape
    D = D3 // 3
    dh = D // heads
    tq = _tile(S, tq)
    tk = _tile(S, tk)
    split_qkv = (D % 128 == 0)          # lane-aligned per-tensor blocks
    if split_qkv:
        q_spec = pl.BlockSpec((1, tq, D), lambda b, i, j: (b, i, 0))
        k_spec = pl.BlockSpec((1, tk, D), lambda b, i, j: (b, j, 1))
        v_spec = pl.BlockSpec((1, tk, D), lambda b, i, j: (b, j, 2))
    else:                               # tiny / unaligned D: fused 3D columns
        q_spec = pl.BlockSpec((1, tq, D3), lambda b, i, j: (b, i, 0))
        k_spec = pl.BlockSpec((1, tk, D3), lambda b, i, j: (b, j, 0))
        v_spec = pl.BlockSpec((1, tk, D3), lambda b, i, j: (b, j, 0))
    kern = functools.partial(flash_attn_kernel, heads=heads,
                             scale=float(dh) ** -0.5, split_qkv=split_qkv)
    return pl.pallas_call(
        kern,
        out_shape=jax.ShapeDtypeStruct((B, S, D), residual.dtype),
        grid=(B, S // tq, S // tk),
        in_specs=[q_spec, k_spec, v_spec,
                  pl.BlockSpec((D, D), lambda b, i, j: (0, 0)),
                  pl.BlockSpec((1, D), lambda b, i, j: (0, 0)),
                  pl.BlockSpec((1, tq, D), lambda b, i, j: (b, i, 0))],
        out_specs=pl.BlockSpec((1, tq, D), lambda b, i, j: (b, i, 0)),
        scratch_shapes=[pltpu.VMEM((heads, tq, 1), jnp.float32),   # m
                        pltpu.VMEM((heads, tq, 1), jnp.float32),   # l
                        pltpu.VMEM((heads, tq, dh), jnp.float32)], # acc
        compiler_params=pltpu.CompilerParams(
            dimension_semantics=("parallel", "parallel", "arbitrary"),
            vmem_limit_bytes=VMEM_LIMIT),
    )(qkv, qkv, qkv, wo, bo.reshape(1, D), residual)


# ------------------------------- parameters -------------------------------- #

def init_params(key, model_dim, depth, heads):
    D = model_dim
    F = 4 * D
    layers = []
    for li in range(depth):
        k = jax.random.fold_in(key, li)
        ks = jax.random.split(k, 4)
        layers.append(dict(
            ln1_g=jnp.ones((D,), jnp.float32),
            ln1_b=jnp.zeros((D,), jnp.float32),
            # Q|K|V fused into one (D, 3D) projection, bf16 for the MXU.
            w_qkv=(jax.random.normal(ks[0], (D, 3 * D), jnp.float32)
                   * (D ** -0.5)).astype(jnp.bfloat16),
            b_qkv=jnp.zeros((3 * D,), jnp.float32),
            wo=(jax.random.normal(ks[1], (D, D), jnp.float32)
                * (D ** -0.5)).astype(jnp.bfloat16),
            bo=jnp.zeros((D,), jnp.float32),
            ln2_g=jnp.ones((D,), jnp.float32),
            ln2_b=jnp.zeros((D,), jnp.float32),
            w1=(jax.random.normal(ks[2], (D, F), jnp.float32)
                * (D ** -0.5)).astype(jnp.bfloat16),
            b1=jnp.zeros((F,), jnp.float32),
            w2=(jax.random.normal(ks[3], (F, D), jnp.float32)
                * (F ** -0.5)).astype(jnp.bfloat16),
            b2=jnp.zeros((D,), jnp.float32),
        ))
    return dict(
        heads=heads,
        layers=layers,
        lnf_g=jnp.ones((D,), jnp.float32),
        lnf_b=jnp.zeros((D,), jnp.float32),
    )


# -------------------------------- forward ----------------------------------- #

def vector_former_forward(params, x):
    B, S, D = x.shape
    H = params["heads"]
    h2d = x.reshape(B * S, D).astype(jnp.float32)   # residual stream in f32
    for layer in params["layers"]:
        # --- attention block: LN1 + QKV projection fused (bf16 out); flash
        #     attention with W_o / bias / residual fused into its epilogue ---
        qkv = ln_matmul(h2d, layer["ln1_g"], layer["ln1_b"],
                        layer["w_qkv"], layer["b_qkv"],
                        out_dtype=jnp.bfloat16)                   # (B*S, 3D)
        h3d = flash_attention(qkv.reshape(B, S, 3 * D), layer["wo"],
                              layer["bo"], h2d.reshape(B, S, D), H)
        h2d = h3d.reshape(B * S, D)                               # h + W_o@attn
        # --- MLP block: LN2 + up-projection + GELU fused (bf16 out); down-
        #     projection with bias + residual fused, f32 in-place accumulation ---
        ff = ln_matmul(h2d, layer["ln2_g"], layer["ln2_b"],
                       layer["w1"], layer["b1"], activation="gelu",
                       out_dtype=jnp.bfloat16)                    # (B*S, 4D)
        h2d = matmul_residual(ff, layer["w2"], layer["b2"], residual=h2d)
    out = layernorm(h2d, params["lnf_g"], params["lnf_b"])
    # Transformer returns a tuple; VectorFormer.forward takes element [0].
    return out.reshape(B, S, D)


# ---------------------------------- main ------------------------------------ #

if __name__ == "__main__":
    batch, seq, model_dim, depth, heads = 2, 8, 32, 2, 4
    key = jax.random.PRNGKey(0)
    kx, kp = jax.random.split(key)
    x = jax.random.normal(kx, (batch, seq, model_dim), jnp.float32)
    params = init_params(kp, model_dim, depth, heads)

    fwd = jax.jit(functools.partial(vector_former_forward, params))
    y = fwd(x)
    jax.block_until_ready(y)
    assert y.shape == (batch, seq, model_dim)
    assert bool(jnp.all(jnp.isfinite(y)))
    print("KERNEL_OK")
</pallas_src>

<mosaic_0001>
module attributes {stable_mosaic.version = 11 : i64} {
  func.func @ln_matmul_kernel(%arg0: i32, %arg1: i32, %arg2: memref<16x32xf32, #tpu.memory_space<vmem>>, %arg3: memref<1x32xf32, #tpu.memory_space<vmem>>, %arg4: memref<1x32xf32, #tpu.memory_space<vmem>>, %arg5: memref<32x96xbf16, #tpu.memory_space<vmem>>, %arg6: memref<1x96xf32, #tpu.memory_space<vmem>>, %arg7: memref<16x96xbf16, #tpu.memory_space<vmem>>, %arg8: memref<16x32xbf16, #tpu.memory_space<vmem>>) attributes {dimension_semantics = [#tpu.dimension_semantics<parallel>, #tpu.dimension_semantics<arbitrary>], iteration_bounds = array<i64: 1, 1>, scalar_prefetch = 0 : i64, scratch_operands = 1 : i64, tpu.core_type = #tpu.core_type<tc>, window_params = [{transform_indices = @transform_0, window_bounds = array<i64: 16, 32>}, {pipeline_mode = #tpu.pipeline_mode<synchronous>, transform_indices = @transform_1, window_bounds = array<i64: 1, 32>}, {pipeline_mode = #tpu.pipeline_mode<synchronous>, transform_indices = @transform_2, window_bounds = array<i64: 1, 32>}, {transform_indices = @transform_3, window_bounds = array<i64: 32, 96>}, {transform_indices = @transform_4, window_bounds = array<i64: 1, 96>}, {transform_indices = @transform_5, window_bounds = array<i64: 16, 96>}]} {
    %c0_i32 = arith.constant 0 : i32
    %0 = arith.cmpi eq, %arg1, %c0_i32 : i32
    %1 = arith.extui %0 : i1 to i32
    %c0_i32_0 = arith.constant 0 : i32
    %2 = arith.cmpi ne, %1, %c0_i32_0 : i32
    scf.if %2 {
      %c0_8 = arith.constant 0 : index
      %c0_9 = arith.constant 0 : index
      %11 = vector.load %arg2[%c0_8, %c0_9] : memref<16x32xf32, #tpu.memory_space<vmem>>, vector<16x32xf32>
      %cst_10 = arith.constant dense<0.000000e+00> : vector<16xf32>
      %12 = vector.multi_reduction <add>, %11, %cst_10 [1] : vector<16x32xf32> to vector<16xf32>
      %13 = vector.shape_cast %12 : vector<16xf32> to vector<16x1xf32>
      %cst_11 = arith.constant 3.200000e+01 : f32
      %14 = vector.broadcast %cst_11 : f32 to vector<16x1xf32>
      %15 = arith.divf %13, %14 : vector<16x1xf32>
      %16 = vector.broadcast %15 : vector<16x1xf32> to vector<16x32xf32>
      %17 = arith.subf %11, %16 : vector<16x32xf32>
      %18 = arith.mulf %17, %17 : vector<16x32xf32>
      %cst_12 = arith.constant dense<0.000000e+00> : vector<16xf32>
      %19 = vector.multi_reduction <add>, %18, %cst_12 [1] : vector<16x32xf32> to vector<16xf32>
      %20 = vector.shape_cast %19 : vector<16xf32> to vector<16x1xf32>
      %cst_13 = arith.constant 3.200000e+01 : f32
      %21 = vector.broadcast %cst_13 : f32 to vector<16x1xf32>
      %22 = arith.divf %20, %21 : vector<16x1xf32>
      %23 = vector.broadcast %15 : vector<16x1xf32> to vector<16x32xf32>
      %24 = arith.subf %11, %23 : vector<16x32xf32>
      %cst_14 = arith.constant 9.99999974E-6 : f32
      %25 = vector.broadcast %cst_14 : f32 to vector<16x1xf32>
      %26 = arith.addf %22, %25 : vector<16x1xf32>
      %27 = math.rsqrt %26 : vector<16x1xf32>
      %28 = vector.broadcast %27 : vector<16x1xf32> to vector<16x32xf32>
      %29 = arith.mulf %24, %28 : vector<16x32xf32>
      %c0_15 = arith.constant 0 : index
      %c0_16 = arith.constant 0 : index
      %30 = vector.load %arg3[%c0_15, %c0_16] : memref<1x32xf32, #tpu.memory_space<vmem>>, vector<1x32xf32>
      %31 = vector.broadcast %30 : vector<1x32xf32> to vector<16x32xf32>
      %32 = arith.mulf %29, %31 : vector<16x32xf32>
      %c0_17 = arith.constant 0 : index
      %c0_18 = arith.constant 0 : index
      %33 = vector.load %arg4[%c0_17, %c0_18] : memref<1x32xf32, #tpu.memory_space<vmem>>, vector<1x32xf32>
      %34 = vector.broadcast %33 : vector<1x32xf32> to vector<16x32xf32>
      %35 = arith.addf %32, %34 : vector<16x32xf32>
      %36 = arith.truncf %35 : vector<16x32xf32> to vector<16x32xbf16>
      %c0_19 = arith.constant 0 : index
      %c0_20 = arith.constant 0 : index
      %37 = vector.load %arg8[%c0_19, %c0_20] : memref<16x32xbf16, #tpu.memory_space<vmem>>, vector<16x32xbf16>
      tpu.vector_store %arg8[%c0_19, %c0_20], %36 {strides = array<i32>} : memref<16x32xbf16, #tpu.memory_space<vmem>>, vector<16x32xbf16>,
    } else {
    }
    %c0 = arith.constant 0 : index
    %c0_1 = arith.constant 0 : index
    %3 = vector.load %arg8[%c0, %c0_1] : memref<16x32xbf16, #tpu.memory_space<vmem>>, vector<16x32xbf16>
    %c0_2 = arith.constant 0 : index
    %c0_3 = arith.constant 0 : index
    %4 = vector.load %arg5[%c0_2, %c0_3] : memref<32x96xbf16, #tpu.memory_space<vmem>>, vector<32x96xbf16>
    %cst = arith.constant dense<0.000000e+00> : vector<16x96xf32>
    %5 = tpu.matmul %3, %4, %cst {dimension_numbers = #tpu.dot_dimension_numbers<[1], [0], [0], [1], [0, 0, 1, 1], [], []>} : vector<16x32xbf16>, vector<32x96xbf16>, vector<16x96xf32> -> vector<16x96xf32>
    %c0_4 = arith.constant 0 : index
    %c0_5 = arith.constant 0 : index
    %6 = vector.load %arg6[%c0_4, %c0_5] : memref<1x96xf32, #tpu.memory_space<vmem>>, vector<1x96xf32>
    %7 = vector.broadcast %6 : vector<1x96xf32> to vector<16x96xf32>
    %8 = arith.addf %5, %7 : vector<16x96xf32>
    %9 = arith.truncf %8 : vector<16x96xf32> to vector<16x96xbf16>
    %c0_6 = arith.constant 0 : index
    %c0_7 = arith.constant 0 : index
    %10 = vector.load %arg7[%c0_6, %c0_7] : memref<16x96xbf16, #tpu.memory_space<vmem>>, vector<16x96xbf16>
    tpu.vector_store %arg7[%c0_6, %c0_7], %9 {strides = array<i32>} : memref<16x96xbf16, #tpu.memory_space<vmem>>, vector<16x96xbf16>,
    return
  }
  func.func @transform_0(%arg0: i32, %arg1: i32) -> (i32, i32) {
    %c0_i32 = arith.constant 0 : i32
    %c0_i32_0 = arith.constant 0 : i32
    return %arg0, %c0_i32 : i32, i32
  }
  func.func @transform_1(%arg0: i32, %arg1: i32) -> (i32, i32) {
    %c0_i32 = arith.constant 0 : i32
    %c0_i32_0 = arith.constant 0 : i32
    %c0_i32_1 = arith.constant 0 : i32
    return %c0_i32, %c0_i32_0 : i32, i32
  }
  func.func @transform_2(%arg0: i32, %arg1: i32) -> (i32, i32) {
    %c0_i32 = arith.constant 0 : i32
    %c0_i32_0 = arith.constant 0 : i32
    %c0_i32_1 = arith.constant 0 : i32
    return %c0_i32, %c0_i32_0 : i32, i32
  }
  func.func @transform_3(%arg0: i32, %arg1: i32) -> (i32, i32) {
    %c0_i32 = arith.constant 0 : i32
    %c0_i32_0 = arith.constant 0 : i32
    return %c0_i32, %arg1 : i32, i32
  }
  func.func @transform_4(%arg0: i32, %arg1: i32) -> (i32, i32) {
    %c0_i32 = arith.constant 0 : i32
    %c0_i32_0 = arith.constant 0 : i32
    return %c0_i32, %arg1 : i32, i32
  }
  func.func @transform_5(%arg0: i32, %arg1: i32) -> (i32, i32) {
    %c0_i32 = arith.constant 0 : i32
    return %arg0, %arg1 : i32, i32
  }
}

module attributes {stable_mosaic.version = 11 : i64} {
  func.func @flash_attn_kernel(%arg0: i32, %arg1: i32, %arg2: i32, %arg3: memref<1x8x96xbf16, #tpu.memory_space<vmem>>, %arg4: memref<1x8x96xbf16, #tpu.memory_space<vmem>>, %arg5: memref<1x8x96xbf16, #tpu.memory_space<vmem>>, %arg6: memref<32x32xbf16, #tpu.memory_space<vmem>>, %arg7: memref<1x32xf32, #tpu.memory_space<vmem>>, %arg8: memref<1x8x32xf32, #tpu.memory_space<vmem>>, %arg9: memref<1x8x32xf32, #tpu.memory_space<vmem>>, %arg10: memref<4x8x1xf32, #tpu.memory_space<vmem>>, %arg11: memref<4x8x1xf32, #tpu.memory_space<vmem>>, %arg12: memref<4x8x8xf32, #tpu.memory_space<vmem>>) attributes {dimension_semantics = [#tpu.dimension_semantics<parallel>, #tpu.dimension_semantics<parallel>, #tpu.dimension_semantics<arbitrary>], iteration_bounds = array<i64: 2, 1, 1>, scalar_prefetch = 0 : i64, scratch_operands = 3 : i64, tpu.core_type = #tpu.core_type<tc>, window_params = [{transform_indices = @transform_0, window_bounds = array<i64: 1, 8, 96>}, {transform_indices = @transform_1, window_bounds = array<i64: 1, 8, 96>}, {transform_indices = @transform_2, window_bounds = array<i64: 1, 8, 96>}, {pipeline_mode = #tpu.pipeline_mode<synchronous>, transform_indices = @transform_3, window_bounds = array<i64: 32, 32>}, {pipeline_mode = #tpu.pipeline_mode<synchronous>, transform_indices = @transform_4, window_bounds = array<i64: 1, 32>}, {transform_indices = @transform_5, window_bounds = array<i64: 1, 8, 32>}, {transform_indices = @transform_6, window_bounds = array<i64: 1, 8, 32>}]} {
    %c0_i32 = arith.constant 0 : i32
    %0 = arith.cmpi eq, %arg2, %c0_i32 : i32
    %1 = arith.extui %0 : i1 to i32
    %c0_i32_0 = arith.constant 0 : i32
    %2 = arith.cmpi ne, %1, %c0_i32_0 : i32
    scf.if %2 {
      %cst_33 = arith.constant 0xFF800000 : f32
      %44 = vector.broadcast %cst_33 : f32 to vector<4x8x1xf32>
      %c0_34 = arith.constant 0 : index
      %c0_35 = arith.constant 0 : index
      %c0_36 = arith.constant 0 : index
      %45 = vector.load %arg10[%c0_34, %c0_35, %c0_36] : memref<4x8x1xf32, #tpu.memory_space<vmem>>, vector<4x8x1xf32>
      tpu.vector_store %arg10[%c0_34, %c0_35, %c0_36], %44 {strides = array<i32>} : memref<4x8x1xf32, #tpu.memory_space<vmem>>, vector<4x8x1xf32>,
      %cst_37 = arith.constant 0.000000e+00 : f32
      %46 = vector.broadcast %cst_37 : f32 to vector<4x8x1xf32>
      %c0_38 = arith.constant 0 : index
      %c0_39 = arith.constant 0 : index
      %c0_40 = arith.constant 0 : index
      %47 = vector.load %arg11[%c0_38, %c0_39, %c0_40] : memref<4x8x1xf32, #tpu.memory_space<vmem>>, vector<4x8x1xf32>
      tpu.vector_store %arg11[%c0_38, %c0_39, %c0_40], %46 {strides = array<i32>} : memref<4x8x1xf32, #tpu.memory_space<vmem>>, vector<4x8x1xf32>,
      %cst_41 = arith.constant 0.000000e+00 : f32
      %48 = vector.broadcast %cst_41 : f32 to vector<4x8x8xf32>
      %c0_42 = arith.constant 0 : index
      %c0_43 = arith.constant 0 : index
      %c0_44 = arith.constant 0 : index
      %49 = vector.load %arg12[%c0_42, %c0_43, %c0_44] : memref<4x8x8xf32, #tpu.memory_space<vmem>>, vector<4x8x8xf32>
      tpu.vector_store %arg12[%c0_42, %c0_43, %c0_44], %48 {strides = array<i32>} : memref<4x8x8xf32, #tpu.memory_space<vmem>>, vector<4x8x8xf32>,
    } else {
    }
    %c0 = arith.constant 0 : index
    %c0_1 = arith.constant 0 : index
    %c0_2 = arith.constant 0 : index
    %3 = vector.load %arg3[%c0, %c0_1, %c0_2] : memref<1x8x96xbf16, #tpu.memory_space<vmem>>, vector<1x8x96xbf16>
    %4 = vector.shape_cast %3 : vector<1x8x96xbf16> to vector<8x96xbf16>
    %5 = vector.extract_strided_slice %4 {offsets = [0, 0], sizes = [8, 32], strides = [1, 1]} : vector<8x96xbf16> to vector<8x32xbf16>
    %c0_3 = arith.constant 0 : index
    %c0_4 = arith.constant 0 : index
    %c0_5 = arith.constant 0 : index
    %6 = vector.load %arg4[%c0_3, %c0_4, %c0_5] : memref<1x8x96xbf16, #tpu.memory_space<vmem>>, vector<1x8x96xbf16>
    %7 = vector.shape_cast %6 : vector<1x8x96xbf16> to vector<8x96xbf16>
    %8 = vector.extract_strided_slice %7 {offsets = [0, 32], sizes = [8, 32], strides = [1, 1]} : vector<8x96xbf16> to vector<8x32xbf16>
    %c0_6 = arith.constant 0 : index
    %c0_7 = arith.constant 0 : index
    %c0_8 = arith.constant 0 : index
    %9 = vector.load %arg5[%c0_6, %c0_7, %c0_8] : memref<1x8x96xbf16, #tpu.memory_space<vmem>>, vector<1x8x96xbf16>
    %10 = vector.shape_cast %9 : vector<1x8x96xbf16> to vector<8x96xbf16>
    %11 = vector.extract_strided_slice %10 {offsets = [0, 64], sizes = [8, 32], strides = [1, 1]} : vector<8x96xbf16> to vector<8x32xbf16>
    %12 = vector.shape_cast %5 : vector<8x32xbf16> to vector<8x4x8xbf16>
    %13 = vector.shape_cast %8 : vector<8x32xbf16> to vector<8x4x8xbf16>
    %14 = vector.shape_cast %11 : vector<8x32xbf16> to vector<8x4x8xbf16>
    "tpu.trace_start"() <{level = 10 : i32, message = "qhd,khd->hqk"}> : () -> ()
    %cst = arith.constant dense<0.000000e+00> : vector<4x8x8xf32>
    %15 = tpu.matmul %12, %13, %cst {dimension_numbers = #tpu.dot_dimension_numbers<[2], [2], [0], [0], [0, 1, 0, 0, 1, 0], [1], [1]>} : vector<8x4x8xbf16>, vector<8x4x8xbf16>, vector<4x8x8xf32> -> vector<4x8x8xf32>
    "tpu.trace_stop"() : () -> ()
    %cst_9 = arith.constant 0.353553385 : f32
    %16 = vector.broadcast %cst_9 : f32 to vector<4x8x8xf32>
    %17 = arith.mulf %15, %16 : vector<4x8x8xf32>
    %c0_10 = arith.constant 0 : index
    %c0_11 = arith.constant 0 : index
    %c0_12 = arith.constant 0 : index
    %18 = vector.load %arg10[%c0_10, %c0_11, %c0_12] : memref<4x8x1xf32, #tpu.memory_space<vmem>>, vector<4x8x1xf32>
    %cst_13 = arith.constant dense<0xFF800000> : vector<4x8xf32>
    %19 = vector.multi_reduction <maximumf>, %17, %cst_13 [2] : vector<4x8x8xf32> to vector<4x8xf32>
    %20 = vector.shape_cast %19 : vector<4x8xf32> to vector<4x8x1xf32>
    %21 = arith.maximumf %18, %20 : vector<4x8x1xf32>
    %22 = arith.subf %18, %21 : vector<4x8x1xf32>
    %23 = math.exp %22 : vector<4x8x1xf32>
    %24 = vector.broadcast %21 : vector<4x8x1xf32> to vector<4x8x8xf32>
    %25 = arith.subf %17, %24 : vector<4x8x8xf32>
    %26 = math.exp %25 : vector<4x8x8xf32>
    %c0_14 = arith.constant 0 : index
    %c0_15 = arith.constant 0 : index
    %c0_16 = arith.constant 0 : index
    %27 = vector.load %arg11[%c0_14, %c0_15, %c0_16] : memref<4x8x1xf32, #tpu.memory_space<vmem>>, vector<4x8x1xf32>
    %28 = arith.mulf %23, %27 : vector<4x8x1xf32>
    %cst_17 = arith.constant dense<0.000000e+00> : vector<4x8xf32>
    %29 = vector.multi_reduction <add>, %26, %cst_17 [2] : vector<4x8x8xf32> to vector<4x8xf32>
    %30 = vector.shape_cast %29 : vector<4x8xf32> to vector<4x8x1xf32>
    %31 = arith.addf %28, %30 : vector<4x8x1xf32>
    %c0_18 = arith.constant 0 : index
    %c0_19 = arith.constant 0 : index
    %c0_20 = arith.constant 0 : index
    %32 = vector.load %arg11[%c0_18, %c0_19, %c0_20] : memref<4x8x1xf32, #tpu.memory_space<vmem>>, vector<4x8x1xf32>
    tpu.vector_store %arg11[%c0_18, %c0_19, %c0_20], %31 {strides = array<i32>} : memref<4x8x1xf32, #tpu.memory_space<vmem>>, vector<4x8x1xf32>,
    %c0_21 = arith.constant 0 : index
    %c0_22 = arith.constant 0 : index
    %c0_23 = arith.constant 0 : index
    %33 = vector.load %arg12[%c0_21, %c0_22, %c0_23] : memref<4x8x8xf32, #tpu.memory_space<vmem>>, vector<4x8x8xf32>
    %34 = vector.broadcast %23 : vector<4x8x1xf32> to vector<4x8x8xf32>
    %35 = arith.mulf %34, %33 : vector<4x8x8xf32>
    %36 = arith.truncf %26 : vector<4x8x8xf32> to vector<4x8x8xbf16>
    "tpu.trace_start"() <{level = 10 : i32, message = "hqk,khd->hqd"}> : () -> ()
    %cst_24 = arith.constant dense<0.000000e+00> : vector<4x8x8xf32>
    %37 = tpu.matmul %36, %14, %cst_24 {dimension_numbers = #tpu.dot_dimension_numbers<[2], [0], [1], [2], [0, 0, 0, 1, 1, 2], [0], [1]>} : vector<4x8x8xbf16>, vector<8x4x8xbf16>, vector<4x8x8xf32> -> vector<4x8x8xf32>
    "tpu.trace_stop"() : () -> ()
    %38 = arith.addf %35, %37 : vector<4x8x8xf32>
    %c0_25 = arith.constant 0 : index
    %c0_26 = arith.constant 0 : index
    %c0_27 = arith.constant 0 : index
    %39 = vector.load %arg12[%c0_25, %c0_26, %c0_27] : memref<4x8x8xf32, #tpu.memory_space<vmem>>, vector<4x8x8xf32>
    tpu.vector_store %arg12[%c0_25, %c0_26, %c0_27], %38 {strides = array<i32>} : memref<4x8x8xf32, #tpu.memory_space<vmem>>, vector<4x8x8xf32>,
    %c0_28 = arith.constant 0 : index
    %c0_29 = arith.constant 0 : index
    %c0_30 = arith.constant 0 : index
    %40 = vector.load %arg10[%c0_28, %c0_29, %c0_30] : memref<4x8x1xf32, #tpu.memory_space<vmem>>, vector<4x8x1xf32>
    tpu.vector_store %arg10[%c0_28, %c0_29, %c0_30], %21 {strides = array<i32>} : memref<4x8x1xf32, #tpu.memory_space<vmem>>, vector<4x8x1xf32>,
    %c0_i32_31 = arith.constant 0 : i32
    %41 = arith.cmpi eq, %arg2, %c0_i32_31 : i32
    %42 = arith.extui %41 : i1 to i32
    %c0_i32_32 = arith.constant 0 : i32
    %43 = arith.cmpi ne, %42, %c0_i32_32 : i32
    scf.if %43 {
      %c0_33 = arith.constant 0 : index
      %c0_34 = arith.constant 0 : index
      %c0_35 = arith.constant 0 : index
      %44 = vector.load %arg12[%c0_33, %c0_34, %c0_35] : memref<4x8x8xf32, #tpu.memory_space<vmem>>, vector<4x8x8xf32>
      %c0_36 = arith.constant 0 : index
      %c0_37 = arith.constant 0 : index
      %c0_38 = arith.constant 0 : index
      %45 = vector.load %arg11[%c0_36, %c0_37, %c0_38] : memref<4x8x1xf32, #tpu.memory_space<vmem>>, vector<4x8x1xf32>
      %46 = tpu.reciprocal %45 {approx = true} : vector<4x8x1xf32> -> vector<4x8x1xf32>
      %47 = vector.broadcast %46 : vector<4x8x1xf32> to vector<4x8x8xf32>
      %48 = arith.mulf %44, %47 : vector<4x8x8xf32>
      %49 = vector.extract_strided_slice %48 {offsets = [0, 0, 0], sizes = [1, 8, 8], strides = [1, 1, 1]} : vector<4x8x8xf32> to vector<1x8x8xf32>
      %50 = vector.shape_cast %49 : vector<1x8x8xf32> to vector<8x8xf32>
      %51 = vector.extract_strided_slice %48 {offsets = [1, 0, 0], sizes = [1, 8, 8], strides = [1, 1, 1]} : vector<4x8x8xf32> to vector<1x8x8xf32>
      %52 = vector.shape_cast %51 : vector<1x8x8xf32> to vector<8x8xf32>
      %53 = vector.extract_strided_slice %48 {offsets = [2, 0, 0], sizes = [1, 8, 8], strides = [1, 1, 1]} : vector<4x8x8xf32> to vector<1x8x8xf32>
      %54 = vector.shape_cast %53 : vector<1x8x8xf32> to vector<8x8xf32>
      %55 = vector.extract_strided_slice %48 {offsets = [3, 0, 0], sizes = [1, 8, 8], strides = [1, 1, 1]} : vector<4x8x8xf32> to vector<1x8x8xf32>
      %56 = vector.shape_cast %55 : vector<1x8x8xf32> to vector<8x8xf32>
      %57 = tpu.concatenate %50, %52, %54, %56 in 1 : vector<8x8xf32>, vector<8x8xf32>, vector<8x8xf32>, vector<8x8xf32> -> vector<8x32xf32>
      %58 = arith.truncf %57 : vector<8x32xf32> to vector<8x32xbf16>
      %c0_39 = arith.constant 0 : index
      %c0_40 = arith.constant 0 : index
      %59 = vector.load %arg6[%c0_39, %c0_40] : memref<32x32xbf16, #tpu.memory_space<vmem>>, vector<32x32xbf16>
      %cst_41 = arith.constant dense<0.000000e+00> : vector<8x32xf32>
      %60 = tpu.matmul %58, %59, %cst_41 {dimension_numbers = #tpu.dot_dimension_numbers<[1], [0], [0], [1], [0, 0, 1, 1], [], []>} : vector<8x32xbf16>, vector<32x32xbf16>, vector<8x32xf32> -> vector<8x32xf32>
      %c0_42 = arith.constant 0 : index
      %c0_43 = arith.constant 0 : index
      %61 = vector.load %arg7[%c0_42, %c0_43] : memref<1x32xf32, #tpu.memory_space<vmem>>, vector<1x32xf32>
      %62 = vector.broadcast %61 : vector<1x32xf32> to vector<8x32xf32>
      %63 = arith.addf %60, %62 : vector<8x32xf32>
      %c0_44 = arith.constant 0 : index
      %c0_45 = arith.constant 0 : index
      %c0_46 = arith.constant 0 : index
      %64 = vector.load %arg8[%c0_44, %c0_45, %c0_46] : memref<1x8x32xf32, #tpu.memory_space<vmem>>, vector<1x8x32xf32>
      %65 = vector.shape_cast %64 : vector<1x8x32xf32> to vector<8x32xf32>
      %66 = arith.addf %63, %65 : vector<8x32xf32>
      %c0_47 = arith.constant 0 : index
      %c0_48 = arith.constant 0 : index
      %c0_49 = arith.constant 0 : index
      %67 = vector.load %arg9[%c0_47, %c0_48, %c0_49] : memref<1x8x32xf32, #tpu.memory_space<vmem>>, vector<1x8x32xf32>
      %68 = vector.shape_cast %67 : vector<1x8x32xf32> to vector<8x32xf32>
      %69 = vector.shape_cast %66 : vector<8x32xf32> to vector<1x8x32xf32>
      tpu.vector_store %arg9[%c0_47, %c0_48, %c0_49], %69 {strides = array<i32>} : memref<1x8x32xf32, #tpu.memory_space<vmem>>, vector<1x8x32xf32>,
    } else {
    }
    return
  }
  func.func @transform_0(%arg0: i32, %arg1: i32, %arg2: i32) -> (i32, i32, i32) {
    %c0_i32 = arith.constant 0 : i32
    %c0_i32_0 = arith.constant 0 : i32
    return %arg0, %arg1, %c0_i32 : i32, i32, i32
  }
  func.func @transform_1(%arg0: i32, %arg1: i32, %arg2: i32) -> (i32, i32, i32) {
    %c0_i32 = arith.constant 0 : i32
    %c0_i32_0 = arith.constant 0 : i32
    return %arg0, %arg2, %c0_i32 : i32, i32, i32
  }
  func.func @transform_2(%arg0: i32, %arg1: i32, %arg2: i32) -> (i32, i32, i32) {
    %c0_i32 = arith.constant 0 : i32
    %c0_i32_0 = arith.constant 0 : i32
    return %arg0, %arg2, %c0_i32 : i32, i32, i32
  }
  func.func @transform_3(%arg0: i32, %arg1: i32, %arg2: i32) -> (i32, i32) {
    %c0_i32 = arith.constant 0 : i32
    %c0_i32_0 = arith.constant 0 : i32
    %c0_i32_1 = arith.constant 0 : i32
    return %c0_i32, %c0_i32_0 : i32, i32
  }
  func.func @transform_4(%arg0: i32, %arg1: i32, %arg2: i32) -> (i32, i32) {
    %c0_i32 = arith.constant 0 : i32
    %c0_i32_0 = arith.constant 0 : i32
    %c0_i32_1 = arith.constant 0 : i32
    return %c0_i32, %c0_i32_0 : i32, i32
  }
  func.func @transform_5(%arg0: i32, %arg1: i32, %arg2: i32) -> (i32, i32, i32) {
    %c0_i32 = arith.constant 0 : i32
    %c0_i32_0 = arith.constant 0 : i32
    return %arg0, %arg1, %c0_i32 : i32, i32, i32
  }
  func.func @transform_6(%arg0: i32, %arg1: i32, %arg2: i32) -> (i32, i32, i32) {
    %c0_i32 = arith.constant 0 : i32
    %c0_i32_0 = arith.constant 0 : i32
    return %arg0, %arg1, %c0_i32 : i32, i32, i32
  }
}

module attributes {stable_mosaic.version = 11 : i64} {
  func.func @ln_matmul_kernel(%arg0: i32, %arg1: i32, %arg2: memref<16x32xf32, #tpu.memory_space<vmem>>, %arg3: memref<1x32xf32, #tpu.memory_space<vmem>>, %arg4: memref<1x32xf32, #tpu.memory_space<vmem>>, %arg5: memref<32x128xbf16, #tpu.memory_space<vmem>>, %arg6: memref<1x128xf32, #tpu.memory_space<vmem>>, %arg7: memref<16x128xbf16, #tpu.memory_space<vmem>>, %arg8: memref<16x32xbf16, #tpu.memory_space<vmem>>) attributes {dimension_semantics = [#tpu.dimension_semantics<parallel>, #tpu.dimension_semantics<arbitrary>], iteration_bounds = array<i64: 1, 1>, scalar_prefetch = 0 : i64, scratch_operands = 1 : i64, tpu.core_type = #tpu.core_type<tc>, window_params = [{transform_indices = @transform_0, window_bounds = array<i64: 16, 32>}, {pipeline_mode = #tpu.pipeline_mode<synchronous>, transform_indices = @transform_1, window_bounds = array<i64: 1, 32>}, {pipeline_mode = #tpu.pipeline_mode<synchronous>, transform_indices = @transform_2, window_bounds = array<i64: 1, 32>}, {transform_indices = @transform_3, window_bounds = array<i64: 32, 128>}, {transform_indices = @transform_4, window_bounds = array<i64: 1, 128>}, {transform_indices = @transform_5, window_bounds = array<i64: 16, 128>}]} {
    %c0_i32 = arith.constant 0 : i32
    %0 = arith.cmpi eq, %arg1, %c0_i32 : i32
    %1 = arith.extui %0 : i1 to i32
    %c0_i32_0 = arith.constant 0 : i32
    %2 = arith.cmpi ne, %1, %c0_i32_0 : i32
    scf.if %2 {
      %c0_12 = arith.constant 0 : index
      %c0_13 = arith.constant 0 : index
      %24 = vector.load %arg2[%c0_12, %c0_13] : memref<16x32xf32, #tpu.memory_space<vmem>>, vector<16x32xf32>
      %cst_14 = arith.constant dense<0.000000e+00> : vector<16xf32>
      %25 = vector.multi_reduction <add>, %24, %cst_14 [1] : vector<16x32xf32> to vector<16xf32>
      %26 = vector.shape_cast %25 : vector<16xf32> to vector<16x1xf32>
      %cst_15 = arith.constant 3.200000e+01 : f32
      %27 = vector.broadcast %cst_15 : f32 to vector<16x1xf32>
      %28 = arith.divf %26, %27 : vector<16x1xf32>
      %29 = vector.broadcast %28 : vector<16x1xf32> to vector<16x32xf32>
      %30 = arith.subf %24, %29 : vector<16x32xf32>
      %31 = arith.mulf %30, %30 : vector<16x32xf32>
      %cst_16 = arith.constant dense<0.000000e+00> : vector<16xf32>
      %32 = vector.multi_reduction <add>, %31, %cst_16 [1] : vector<16x32xf32> to vector<16xf32>
      %33 = vector.shape_cast %32 : vector<16xf32> to vector<16x1xf32>
      %cst_17 = arith.constant 3.200000e+01 : f32
      %34 = vector.broadcast %cst_17 : f32 to vector<16x1xf32>
      %35 = arith.divf %33, %34 : vector<16x1xf32>
      %36 = vector.broadcast %28 : vector<16x1xf32> to vector<16x32xf32>
      %37 = arith.subf %24, %36 : vector<16x32xf32>
      %cst_18 = arith.constant 9.99999974E-6 : f32
      %38 = vector.broadcast %cst_18 : f32 to vector<16x1xf32>
      %39 = arith.addf %35, %38 : vector<16x1xf32>
      %40 = math.rsqrt %39 : vector<16x1xf32>
      %41 = vector.broadcast %40 : vector<16x1xf32> to vector<16x32xf32>
      %42 = arith.mulf %37, %41 : vector<16x32xf32>
      %c0_19 = arith.constant 0 : index
      %c0_20 = arith.constant 0 : index
      %43 = vector.load %arg3[%c0_19, %c0_20] : memref<1x32xf32, #tpu.memory_space<vmem>>, vector<1x32xf32>
      %44 = vector.broadcast %43 : vector<1x32xf32> to vector<16x32xf32>
      %45 = arith.mulf %42, %44 : vector<16x32xf32>
      %c0_21 = arith.constant 0 : index
      %c0_22 = arith.constant 0 : index
      %46 = vector.load %arg4[%c0_21, %c0_22] : memref<1x32xf32, #tpu.memory_space<vmem>>, vector<1x32xf32>
      %47 = vector.broadcast %46 : vector<1x32xf32> to vector<16x32xf32>
      %48 = arith.addf %45, %47 : vector<16x32xf32>
      %49 = arith.truncf %48 : vector<16x32xf32> to vector<16x32xbf16>
      %c0_23 = arith.constant 0 : index
      %c0_24 = arith.constant 0 : index
      %50 = vector.load %arg8[%c0_23, %c0_24] : memref<16x32xbf16, #tpu.memory_space<vmem>>, vector<16x32xbf16>
      tpu.vector_store %arg8[%c0_23, %c0_24], %49 {strides = array<i32>} : memref<16x32xbf16, #tpu.memory_space<vmem>>, vector<16x32xbf16>,
    } else {
    }
    %c0 = arith.constant 0 : index
    %c0_1 = arith.constant 0 : index
    %3 = vector.load %arg8[%c0, %c0_1] : memref<16x32xbf16, #tpu.memory_space<vmem>>, vector<16x32xbf16>
    %c0_2 = arith.constant 0 : index
    %c0_3 = arith.constant 0 : index
    %4 = vector.load %arg5[%c0_2, %c0_3] : memref<32x128xbf16, #tpu.memory_space<vmem>>, vector<32x128xbf16>
    %cst = arith.constant dense<0.000000e+00> : vector<16x128xf32>
    %5 = tpu.matmul %3, %4, %cst {dimension_numbers = #tpu.dot_dimension_numbers<[1], [0], [0], [1], [0, 0, 1, 1], [], []>} : vector<16x32xbf16>, vector<32x128xbf16>, vector<16x128xf32> -> vector<16x128xf32>
    %c0_4 = arith.constant 0 : index
    %c0_5 = arith.constant 0 : index
    %6 = vector.load %arg6[%c0_4, %c0_5] : memref<1x128xf32, #tpu.memory_space<vmem>>, vector<1x128xf32>
    %7 = vector.broadcast %6 : vector<1x128xf32> to vector<16x128xf32>
    %8 = arith.addf %5, %7 : vector<16x128xf32>
    %9 = arith.mulf %8, %8 : vector<16x128xf32>
    %10 = arith.mulf %8, %9 : vector<16x128xf32>
    %cst_6 = arith.constant 4.471500e-02 : f32
    %11 = vector.broadcast %cst_6 : f32 to vector<16x128xf32>
    %12 = arith.mulf %11, %10 : vector<16x128xf32>
    %13 = arith.addf %8, %12 : vector<16x128xf32>
    %cst_7 = arith.constant 0.797884583 : f32
    %14 = vector.broadcast %cst_7 : f32 to vector<16x128xf32>
    %15 = arith.mulf %14, %13 : vector<16x128xf32>
    %16 = math.tanh %15 : vector<16x128xf32>
    %cst_8 = arith.constant 1.000000e+00 : f32
    %17 = vector.broadcast %cst_8 : f32 to vector<16x128xf32>
    %18 = arith.addf %17, %16 : vector<16x128xf32>
    %cst_9 = arith.constant 5.000000e-01 : f32
    %19 = vector.broadcast %cst_9 : f32 to vector<16x128xf32>
    %20 = arith.mulf %19, %18 : vector<16x128xf32>
    %21 = arith.mulf %8, %20 : vector<16x128xf32>
    %22 = arith.truncf %21 : vector<16x128xf32> to vector<16x128xbf16>
    %c0_10 = arith.constant 0 : index
    %c0_11 = arith.constant 0 : index
    %23 = vector.load %arg7[%c0_10, %c0_11] : memref<16x128xbf16, #tpu.memory_space<vmem>>, vector<16x128xbf16>
    tpu.vector_store %arg7[%c0_10, %c0_11], %22 {strides = array<i32>} : memref<16x128xbf16, #tpu.memory_space<vmem>>, vector<16x128xbf16>,
    return
  }
  func.func @transform_0(%arg0: i32, %arg1: i32) -> (i32, i32) {
    %c0_i32 = arith.constant 0 : i32
    %c0_i32_0 = arith.constant 0 : i32
    return %arg0, %c0_i32 : i32, i32
  }
  func.func @transform_1(%arg0: i32, %arg1: i32) -> (i32, i32) {
    %c0_i32 = arith.constant 0 : i32
    %c0_i32_0 = arith.constant 0 : i32
    %c0_i32_1 = arith.constant 0 : i32
    return %c0_i32, %c0_i32_0 : i32, i32
  }
  func.func @transform_2(%arg0: i32, %arg1: i32) -> (i32, i32) {
    %c0_i32 = arith.constant 0 : i32
    %c0_i32_0 = arith.constant 0 : i32
    %c0_i32_1 = arith.constant 0 : i32
    return %c0_i32, %c0_i32_0 : i32, i32
  }
  func.func @transform_3(%arg0: i32, %arg1: i32) -> (i32, i32) {
    %c0_i32 = arith.constant 0 : i32
    %c0_i32_0 = arith.constant 0 : i32
    return %c0_i32, %arg1 : i32, i32
  }
  func.func @transform_4(%arg0: i32, %arg1: i32) -> (i32, i32) {
    %c0_i32 = arith.constant 0 : i32
    %c0_i32_0 = arith.constant 0 : i32
    return %c0_i32, %arg1 : i32, i32
  }
  func.func @transform_5(%arg0: i32, %arg1: i32) -> (i32, i32) {
    %c0_i32 = arith.constant 0 : i32
    return %arg0, %arg1 : i32, i32
  }
}

module attributes {stable_mosaic.version = 11 : i64} {
  func.func @matmul_residual_kernel(%arg0: i32, %arg1: i32, %arg2: i32, %arg3: memref<16x128xbf16, #tpu.memory_space<vmem>>, %arg4: memref<128x32xbf16, #tpu.memory_space<vmem>>, %arg5: memref<1x32xf32, #tpu.memory_space<vmem>>, %arg6: memref<16x32xf32, #tpu.memory_space<vmem>>, %arg7: memref<16x32xf32, #tpu.memory_space<vmem>>) attributes {dimension_semantics = [#tpu.dimension_semantics<parallel>, #tpu.dimension_semantics<parallel>, #tpu.dimension_semantics<arbitrary>], iteration_bounds = array<i64: 1, 1, 1>, scalar_prefetch = 0 : i64, scratch_operands = 0 : i64, tpu.core_type = #tpu.core_type<tc>, window_params = [{transform_indices = @transform_0, window_bounds = array<i64: 16, 128>}, {transform_indices = @transform_1, window_bounds = array<i64: 128, 32>}, {transform_indices = @transform_2, window_bounds = array<i64: 1, 32>}, {transform_indices = @transform_3, window_bounds = array<i64: 16, 32>}, {transform_indices = @transform_4, window_bounds = array<i64: 16, 32>}]} {
    %c0_i32 = arith.constant 0 : i32
    %0 = arith.cmpi eq, %arg2, %c0_i32 : i32
    %1 = arith.extui %0 : i1 to i32
    %c0_i32_0 = arith.constant 0 : i32
    %2 = arith.cmpi ne, %1, %c0_i32_0 : i32
    scf.if %2 {
      %c0_8 = arith.constant 0 : index
      %c0_9 = arith.constant 0 : index
      %9 = vector.load %arg6[%c0_8, %c0_9] : memref<16x32xf32, #tpu.memory_space<vmem>>, vector<16x32xf32>
      %c0_10 = arith.constant 0 : index
      %c0_11 = arith.constant 0 : index
      %10 = vector.load %arg5[%c0_10, %c0_11] : memref<1x32xf32, #tpu.memory_space<vmem>>, vector<1x32xf32>
      %11 = vector.broadcast %10 : vector<1x32xf32> to vector<16x32xf32>
      %12 = arith.addf %9, %11 : vector<16x32xf32>
      %c0_12 = arith.constant 0 : index
      %c0_13 = arith.constant 0 : index
      %13 = vector.load %arg7[%c0_12, %c0_13] : memref<16x32xf32, #tpu.memory_space<vmem>>, vector<16x32xf32>
      tpu.vector_store %arg7[%c0_12, %c0_13], %12 {strides = array<i32>} : memref<16x32xf32, #tpu.memory_space<vmem>>, vector<16x32xf32>,
    } else {
    }
    %c0 = arith.constant 0 : index
    %c0_1 = arith.constant 0 : index
    %3 = vector.load %arg7[%c0, %c0_1] : memref<16x32xf32, #tpu.memory_space<vmem>>, vector<16x32xf32>
    %c0_2 = arith.constant 0 : index
    %c0_3 = arith.constant 0 : index
    %4 = vector.load %arg3[%c0_2, %c0_3] : memref<16x128xbf16, #tpu.memory_space<vmem>>, vector<16x128xbf16>
    %c0_4 = arith.constant 0 : index
    %c0_5 = arith.constant 0 : index
    %5 = vector.load %arg4[%c0_4, %c0_5] : memref<128x32xbf16, #tpu.memory_space<vmem>>, vector<128x32xbf16>
    %cst = arith.constant dense<0.000000e+00> : vector<16x32xf32>
    %6 = tpu.matmul %4, %5, %cst {dimension_numbers = #tpu.dot_dimension_numbers<[1], [0], [0], [1], [0, 0, 1, 1], [], []>} : vector<16x128xbf16>, vector<128x32xbf16>, vector<16x32xf32> -> vector<16x32xf32>
    %7 = arith.addf %3, %6 : vector<16x32xf32>
    %c0_6 = arith.constant 0 : index
    %c0_7 = arith.constant 0 : index
    %8 = vector.load %arg7[%c0_6, %c0_7] : memref<16x32xf32, #tpu.memory_space<vmem>>, vector<16x32xf32>
    tpu.vector_store %arg7[%c0_6, %c0_7], %7 {strides = array<i32>} : memref<16x32xf32, #tpu.memory_space<vmem>>, vector<16x32xf32>,
    return
  }
  func.func @transform_0(%arg0: i32, %arg1: i32, %arg2: i32) -> (i32, i32) {
    %c0_i32 = arith.constant 0 : i32
    return %arg0, %arg2 : i32, i32
  }
  func.func @transform_1(%arg0: i32, %arg1: i32, %arg2: i32) -> (i32, i32) {
    %c0_i32 = arith.constant 0 : i32
    return %arg2, %arg1 : i32, i32
  }
  func.func @transform_2(%arg0: i32, %arg1: i32, %arg2: i32) -> (i32, i32) {
    %c0_i32 = arith.constant 0 : i32
    %c0_i32_0 = arith.constant 0 : i32
    return %c0_i32, %arg1 : i32, i32
  }
  func.func @transform_3(%arg0: i32, %arg1: i32, %arg2: i32) -> (i32, i32) {
    %c0_i32 = arith.constant 0 : i32
    return %arg0, %arg1 : i32, i32
  }
  func.func @transform_4(%arg0: i32, %arg1: i32, %arg2: i32) -> (i32, i32) {
    %c0_i32 = arith.constant 0 : i32
    return %arg0, %arg1 : i32, i32
  }
}

module attributes {stable_mosaic.version = 11 : i64} {
  func.func @layernorm_kernel(%arg0: i32, %arg1: memref<16x32xf32, #tpu.memory_space<vmem>>, %arg2: memref<1x32xf32, #tpu.memory_space<vmem>>, %arg3: memref<1x32xf32, #tpu.memory_space<vmem>>, %arg4: memref<16x32xf32, #tpu.memory_space<vmem>>) attributes {dimension_semantics = [#tpu.dimension_semantics<parallel>], iteration_bounds = array<i64: 1>, scalar_prefetch = 0 : i64, scratch_operands = 0 : i64, tpu.core_type = #tpu.core_type<tc>, window_params = [{transform_indices = @transform_0, window_bounds = array<i64: 16, 32>}, {pipeline_mode = #tpu.pipeline_mode<synchronous>, transform_indices = @transform_1, window_bounds = array<i64: 1, 32>}, {pipeline_mode = #tpu.pipeline_mode<synchronous>, transform_indices = @transform_2, window_bounds = array<i64: 1, 32>}, {transform_indices = @transform_3, window_bounds = array<i64: 16, 32>}]} {
    %c0 = arith.constant 0 : index
    %c0_0 = arith.constant 0 : index
    %0 = vector.load %arg1[%c0, %c0_0] : memref<16x32xf32, #tpu.memory_space<vmem>>, vector<16x32xf32>
    %cst = arith.constant dense<0.000000e+00> : vector<16xf32>
    %1 = vector.multi_reduction <add>, %0, %cst [1] : vector<16x32xf32> to vector<16xf32>
    %2 = vector.shape_cast %1 : vector<16xf32> to vector<16x1xf32>
    %cst_1 = arith.constant 3.200000e+01 : f32
    %3 = vector.broadcast %cst_1 : f32 to vector<16x1xf32>
    %4 = arith.divf %2, %3 : vector<16x1xf32>
    %5 = vector.broadcast %4 : vector<16x1xf32> to vector<16x32xf32>
    %6 = arith.subf %0, %5 : vector<16x32xf32>
    %7 = arith.mulf %6, %6 : vector<16x32xf32>
    %cst_2 = arith.constant dense<0.000000e+00> : vector<16xf32>
    %8 = vector.multi_reduction <add>, %7, %cst_2 [1] : vector<16x32xf32> to vector<16xf32>
    %9 = vector.shape_cast %8 : vector<16xf32> to vector<16x1xf32>
    %cst_3 = arith.constant 3.200000e+01 : f32
    %10 = vector.broadcast %cst_3 : f32 to vector<16x1xf32>
    %11 = arith.divf %9, %10 : vector<16x1xf32>
    %12 = vector.broadcast %4 : vector<16x1xf32> to vector<16x32xf32>
    %13 = arith.subf %0, %12 : vector<16x32xf32>
    %cst_4 = arith.constant 9.99999974E-6 : f32
    %14 = vector.broadcast %cst_4 : f32 to vector<16x1xf32>
    %15 = arith.addf %11, %14 : vector<16x1xf32>
    %16 = math.rsqrt %15 : vector<16x1xf32>
    %17 = vector.broadcast %16 : vector<16x1xf32> to vector<16x32xf32>
    %18 = arith.mulf %13, %17 : vector<16x32xf32>
    %c0_5 = arith.constant 0 : index
    %c0_6 = arith.constant 0 : index
    %19 = vector.load %arg2[%c0_5, %c0_6] : memref<1x32xf32, #tpu.memory_space<vmem>>, vector<1x32xf32>
    %20 = vector.broadcast %19 : vector<1x32xf32> to vector<16x32xf32>
    %21 = arith.mulf %18, %20 : vector<16x32xf32>
    %c0_7 = arith.constant 0 : index
    %c0_8 = arith.constant 0 : index
    %22 = vector.load %arg3[%c0_7, %c0_8] : memref<1x32xf32, #tpu.memory_space<vmem>>, vector<1x32xf32>
    %23 = vector.broadcast %22 : vector<1x32xf32> to vector<16x32xf32>
    %24 = arith.addf %21, %23 : vector<16x32xf32>
    %c0_9 = arith.constant 0 : index
    %c0_10 = arith.constant 0 : index
    %25 = vector.load %arg4[%c0_9, %c0_10] : memref<16x32xf32, #tpu.memory_space<vmem>>, vector<16x32xf32>
    tpu.vector_store %arg4[%c0_9, %c0_10], %24 {strides = array<i32>} : memref<16x32xf32, #tpu.memory_space<vmem>>, vector<16x32xf32>,
    return
  }
  func.func @transform_0(%arg0: i32) -> (i32, i32) {
    %c0_i32 = arith.constant 0 : i32
    %c0_i32_0 = arith.constant 0 : i32
    return %arg0, %c0_i32 : i32, i32
  }
  func.func @transform_1(%arg0: i32) -> (i32, i32) {
    %c0_i32 = arith.constant 0 : i32
    %c0_i32_0 = arith.constant 0 : i32
    %c0_i32_1 = arith.constant 0 : i32
    return %c0_i32, %c0_i32_0 : i32, i32
  }
  func.func @transform_2(%arg0: i32) -> (i32, i32) {
    %c0_i32 = arith.constant 0 : i32
    %c0_i32_0 = arith.constant 0 : i32
    %c0_i32_1 = arith.constant 0 : i32
    return %c0_i32, %c0_i32_0 : i32, i32
  }
  func.func @transform_3(%arg0: i32) -> (i32, i32) {
    %c0_i32 = arith.constant 0 : i32
    %c0_i32_0 = arith.constant 0 : i32
    return %arg0, %c0_i32 : i32, i32
  }
}

module attributes {stable_mosaic.version = 11 : i64} {
  func.func @ln_matmul_kernel(%arg0: i32, %arg1: i32, %arg2: memref<16x32xf32, #tpu.memory_space<vmem>>, %arg3: memref<1x32xf32, #tpu.memory_space<vmem>>, %arg4: memref<1x32xf32, #tpu.memory_space<vmem>>, %arg5: memref<32x96xbf16, #tpu.memory_space<vmem>>, %arg6: memref<1x96xf32, #tpu.memory_space<vmem>>, %arg7: memref<16x96xbf16, #tpu.memory_space<vmem>>, %arg8: memref<16x32xbf16, #tpu.memory_space<vmem>>) attributes {dimension_semantics = [#tpu.dimension_semantics<parallel>, #tpu.dimension_semantics<arbitrary>], iteration_bounds = array<i64: 1, 1>, scalar_prefetch = 0 : i64, scratch_operands = 1 : i64, tpu.core_type = #tpu.core_type<tc>, window_params = [{transform_indices = @transform_0, window_bounds = array<i64: 16, 32>}, {pipeline_mode = #tpu.pipeline_mode<synchronous>, transform_indices = @transform_1, window_bounds = array<i64: 1, 32>}, {pipeline_mode = #tpu.pipeline_mode<synchronous>, transform_indices = @transform_2, window_bounds = array<i64: 1, 32>}, {transform_indices = @transform_3, window_bounds = array<i64: 32, 96>}, {transform_indices = @transform_4, window_bounds = array<i64: 1, 96>}, {transform_indices = @transform_5, window_bounds = array<i64: 16, 96>}]} {
    %c0_i32 = arith.constant 0 : i32
    %0 = arith.cmpi eq, %arg1, %c0_i32 : i32
    %1 = arith.extui %0 : i1 to i32
    %c0_i32_0 = arith.constant 0 : i32
    %2 = arith.cmpi ne, %1, %c0_i32_0 : i32
    scf.if %2 {
      %c0_8 = arith.constant 0 : index
      %c0_9 = arith.constant 0 : index
      %11 = vector.load %arg2[%c0_8, %c0_9] : memref<16x32xf32, #tpu.memory_space<vmem>>, vector<16x32xf32>
      %cst_10 = arith.constant dense<0.000000e+00> : vector<16xf32>
      %12 = vector.multi_reduction <add>, %11, %cst_10 [1] : vector<16x32xf32> to vector<16xf32>
      %13 = vector.shape_cast %12 : vector<16xf32> to vector<16x1xf32>
      %cst_11 = arith.constant 3.200000e+01 : f32
      %14 = vector.broadcast %cst_11 : f32 to vector<16x1xf32>
      %15 = arith.divf %13, %14 : vector<16x1xf32>
      %16 = vector.broadcast %15 : vector<16x1xf32> to vector<16x32xf32>
      %17 = arith.subf %11, %16 : vector<16x32xf32>
      %18 = arith.mulf %17, %17 : vector<16x32xf32>
      %cst_12 = arith.constant dense<0.000000e+00> : vector<16xf32>
      %19 = vector.multi_reduction <add>, %18, %cst_12 [1] : vector<16x32xf32> to vector<16xf32>
      %20 = vector.shape_cast %19 : vector<16xf32> to vector<16x1xf32>
      %cst_13 = arith.constant 3.200000e+01 : f32
      %21 = vector.broadcast %cst_13 : f32 to vector<16x1xf32>
      %22 = arith.divf %20, %21 : vector<16x1xf32>
      %23 = vector.broadcast %15 : vector<16x1xf32> to vector<16x32xf32>
      %24 = arith.subf %11, %23 : vector<16x32xf32>
      %cst_14 = arith.constant 9.99999974E-6 : f32
      %25 = vector.broadcast %cst_14 : f32 to vector<16x1xf32>
      %26 = arith.addf %22, %25 : vector<16x1xf32>
      %27 = math.rsqrt %26 : vector<16x1xf32>
      %28 = vector.broadcast %27 : vector<16x1xf32> to vector<16x32xf32>
      %29 = arith.mulf %24, %28 : vector<16x32xf32>
      %c0_15 = arith.constant 0 : index
      %c0_16 = arith.constant 0 : index
      %30 = vector.load %arg3[%c0_15, %c0_16] : memref<1x32xf32, #tpu.memory_space<vmem>>, vector<1x32xf32>
      %31 = vector.broadcast %30 : vector<1x32xf32> to vector<16x32xf32>
      %32 = arith.mulf %29, %31 : vector<16x32xf32>
      %c0_17 = arith.constant 0 : index
      %c0_18 = arith.constant 0 : index
      %33 = vector.load %arg4[%c0_17, %c0_18] : memref<1x32xf32, #tpu.memory_space<vmem>>, vector<1x32xf32>
      %34 = vector.broadcast %33 : vector<1x32xf32> to vector<16x32xf32>
      %35 = arith.addf %32, %34 : vector<16x32xf32>
      %36 = arith.truncf %35 : vector<16x32xf32> to vector<16x32xbf16>
      %c0_19 = arith.constant 0 : index
      %c0_20 = arith.constant 0 : index
      %37 = vector.load %arg8[%c0_19, %c0_20] : memref<16x32xbf16, #tpu.memory_space<vmem>>, vector<16x32xbf16>
      tpu.vector_store %arg8[%c0_19, %c0_20], %36 {strides = array<i32>} : memref<16x32xbf16, #tpu.memory_space<vmem>>, vector<16x32xbf16>,
    } else {
    }
    %c0 = arith.constant 0 : index
    %c0_1 = arith.constant 0 : index
    %3 = vector.load %arg8[%c0, %c0_1] : memref<16x32xbf16, #tpu.memory_space<vmem>>, vector<16x32xbf16>
    %c0_2 = arith.constant 0 : index
    %c0_3 = arith.constant 0 : index
    %4 = vector.load %arg5[%c0_2, %c0_3] : memref<32x96xbf16, #tpu.memory_space<vmem>>, vector<32x96xbf16>
    %cst = arith.constant dense<0.000000e+00> : vector<16x96xf32>
    %5 = tpu.matmul %3, %4, %cst {dimension_numbers = #tpu.dot_dimension_numbers<[1], [0], [0], [1], [0, 0, 1, 1], [], []>} : vector<16x32xbf16>, vector<32x96xbf16>, vector<16x96xf32> -> vector<16x96xf32>
    %c0_4 = arith.constant 0 : index
    %c0_5 = arith.constant 0 : index
    %6 = vector.load %arg6[%c0_4, %c0_5] : memref<1x96xf32, #tpu.memory_space<vmem>>, vector<1x96xf32>
    %7 = vector.broadcast %6 : vector<1x96xf32> to vector<16x96xf32>
    %8 = arith.addf %5, %7 : vector<16x96xf32>
    %9 = arith.truncf %8 : vector<16x96xf32> to vector<16x96xbf16>
    %c0_6 = arith.constant 0 : index
    %c0_7 = arith.constant 0 : index
    %10 = vector.load %arg7[%c0_6, %c0_7] : memref<16x96xbf16, #tpu.memory_space<vmem>>, vector<16x96xbf16>
    tpu.vector_store %arg7[%c0_6, %c0_7], %9 {strides = array<i32>} : memref<16x96xbf16, #tpu.memory_space<vmem>>, vector<16x96xbf16>,
    return
  }
  func.func @transform_0(%arg0: i32, %arg1: i32) -> (i32, i32) {
    %c0_i32 = arith.constant 0 : i32
    %c0_i32_0 = arith.constant 0 : i32
    return %arg0, %c0_i32 : i32, i32
  }
  func.func @transform_1(%arg0: i32, %arg1: i32) -> (i32, i32) {
    %c0_i32 = arith.constant 0 : i32
    %c0_i32_0 = arith.constant 0 : i32
    %c0_i32_1 = arith.constant 0 : i32
    return %c0_i32, %c0_i32_0 : i32, i32
  }
  func.func @transform_2(%arg0: i32, %arg1: i32) -> (i32, i32) {
    %c0_i32 = arith.constant 0 : i32
    %c0_i32_0 = arith.constant 0 : i32
    %c0_i32_1 = arith.constant 0 : i32
    return %c0_i32, %c0_i32_0 : i32, i32
  }
  func.func @transform_3(%arg0: i32, %arg1: i32) -> (i32, i32) {
    %c0_i32 = arith.constant 0 : i32
    %c0_i32_0 = arith.constant 0 : i32
    return %c0_i32, %arg1 : i32, i32
  }
  func.func @transform_4(%arg0: i32, %arg1: i32) -> (i32, i32) {
    %c0_i32 = arith.constant 0 : i32
    %c0_i32_0 = arith.constant 0 : i32
    return %c0_i32, %arg1 : i32, i32
  }
  func.func @transform_5(%arg0: i32, %arg1: i32) -> (i32, i32) {
    %c0_i32 = arith.constant 0 : i32
    return %arg0, %arg1 : i32, i32
  }
}

</mosaic_0001>

<bundles_post_ra>
// kernel: vector_former_forward.9
= control target key start
LH: loop header
LB: loop body
LE: loop exit
PB: predicated region body
PF: predicated region fallthrough
CT: control target
= control target key end

     0   :  { %10 = vsyncpa [#allocation4], 0  ;;  %s249_s18 = smov [#allocation3]   ;;  %s313_s0 = inlined_call_operand.hbm [shape: f32[16,32], index: 0, kind: input, shape index: {}]   ;;  %s314_s1 = inlined_call_operand.vmem [shape: f32[1,32], index: 1, kind: input, shape index: {}]   ;;  %s315_s2 = inlined_call_operand.vmem [shape: f32[1,32], index: 2, kind: input, shape index: {}]   ;;  %s316_s3 = inlined_call_operand.vmem [shape: bf16[32,96], index: 3, kind: input, shape index: {}]   ;;  %s317_s4 = inlined_call_operand.vmem [shape: f32[1,96], index: 4, kind: input, shape index: {}]   ;;  %s318_s5 = inlined_call_operand.vmem [shape: bf16[16,96], index: 5, kind: output, shape index: {}]  }
   0x1   :  { %s16_s19 = sshll.u32 %s249_s18, 4  ;;  %s17_s19 = int_to_ptr.vmem [resolvable:$true] %s16_s19 }
   0x2   :  { %s235_s20 = scalar_lea.vmem %s17_s19, 256  ;;  %p240_p1 = scmp.lt.s32.totalorder %s17_s19, %s17_s19 }
   0x3   :  { %p236_p0 = scmp.ne.s32.totalorder %s17_s19, %s235_s20  ;;  %p241_p2 = scmp.lt.s32.totalorder %s235_s20, %s235_s20 }
   0x5   :  { %p242_p3 = por %p241_p2, %p240_p1 }
   0x7   :  { %p243_p4 = pnand %p242_p3, %p236_p0 }
   0x9   :  { %246 = shalt.err (!%p243_p4)
}
   0xa   :  { %s250_s21 = smov 128   ;;  %s251_s22 = smov 8  }
   0xb   :  { %22 = dma.hbm_to_vmem [thread:$0]  %s313_s0, 256, %s17_s19, [#allocation4], %s250_s21, %s250_s21, %s251_s22  }
   0xc   :  { %247 = dma.done.wait [#allocation4], 256  }
   0xd   :  { %248 = vsyncadd [#allocation4], 4294967040  ;;  %vm41_vm0 = vcmask 261120   ;;  %v39_v0 = vld [vmem:[#allocation3] sm:$0xff]  ;;  %v40_v1 = vld [vmem:[#allocation3 + $0x8] sm:$0xff]  ;;  %v252_v15 = vmov 0.0  }
   0xe   :  { %v42_v2 = vsel %vm41_vm0, %v39_v0, 0.0  ;;  %v45_v3 = vsel %vm41_vm0, %v40_v1, 0.0  ;;  %v220_v14 = vld [vmem:[%s316_s3 + $0x8] sm:$0xff]   ;;  %207 = vmatprep.subr.bf16.mxu0 %v252_v15  ;;  %vm253_vm1 = vmmov 0   ;;  %v221_v16 = vld [vmem:[%s316_s3] sm:$0xff]   ;;  %vm95_vm2 = vcmask 257024  }
   0xf   :  { %43 = vadd.xlane.f32.xlu0 %v42_v2  ;;  %211 = vmatprep.mubr.msk.bf16.mxu0 %vm253_vm1, %v252_v15  ;;  %v189_v24 = vld [vmem:[%s314_s1] ss:$0 sm:$0xff]  ;;  %vm181_vm3 = vcmask 781312  }
  0x10   :  { %208 = vmatpush3.bf16.msra.mxu0 %v220_v14  ;;  %v190_v26 = vld [vmem:[%s315_s2] ss:$0 sm:$0xff] }
  0x11   :  { %209 = vmatprep.subr.bf16.mxu0 %v252_v15  ;;  %v193_v36 = vld [vmem:[%s317_s4] ss:$0 sm:$0xff] }
  0x13   :  { %46 = vadd.xlane.f32.xlu0 %v45_v3 }
  0x14   :  { %210 = vmatpush3.bf16.msra.mxu0 %v221_v16 }
  0x98   :  { %v44_v4 = vpop.xlane.xlu0 %43 }
  0x99   :  { %v49_v5 = vmul.f32 0.03125, %v44_v4 }
  0x9b   :  { %v51_v6 = vsub.f32 %v39_v0, %v49_v5 }
  0x9c   :  { %v47_v7 = vpop.xlane.xlu0 %46 }
  0x9d   :  { %v50_v8 = vmul.f32 0.03125, %v47_v7  ;;  %v53_v9 = vmul.f32 %v51_v6, %v51_v6 }
  0x9f   :  { %v52_v10 = vsub.f32 %v40_v1, %v50_v8  ;;  %v55_v11 = vsel %vm41_vm0, %v53_v9, 0.0 }
  0xa0   :  { %56 = vadd.xlane.f32.xlu1 %v55_v11 }
  0xa1   :  { %v54_v12 = vmul.f32 %v52_v10, %v52_v10 }
  0xa3   :  { %v58_v13 = vsel %vm41_vm0, %v54_v12, 0.0 }
  0xa4   :  { %59 = vadd.xlane.f32.xlu1 %v58_v13 }
 0x129   :  { %v57_v17 = vpop.xlane.xlu1 %56 }
 0x12a   :  { %v61_v18 = vmul.f32 0.03125, %v57_v17 }
 0x12c   :  { %v63_v19 = vadd.f32 1e-05, %v61_v18 }
 0x12d   :  { %v60_v20 = vpop.xlane.xlu1 %59 }
 0x12e   :  { %223 = vrsqrt.f32 %v63_v19  ;;  %v62_v21 = vmul.f32 0.03125, %v60_v20 }
 0x130   :  { %v64_v22 = vadd.f32 1e-05, %v62_v21 }
 0x132   :  { %225 = vrsqrt.f32 %v64_v22 }
 0x13b   :  { %v224_v23 = vpop.eup %223 }
 0x13c   :  { %v67_v25 = vmul.f32 %v224_v23, %v51_v6 }
 0x13e   :  { %v76_v27 = vmul.f32 %v189_v24, %v67_v25 }
 0x13f   :  { %v226_v28 = vpop.eup %225 }
 0x140   :  { %v85_v29 = vadd.f32 %v190_v26, %v76_v27  ;;  %v68_v30 = vmul.f32 %v226_v28, %v52_v10 }
 0x142   :  { %v200_v31 = vpack.c.bf16 %v85_v29, %v85_v29  ;;  %v77_v32 = vmul.f32 %v189_v24, %v68_v30 }
 0x144   :  { %96 = vst.msk [vmem:[#allocation2] sm:$0xf] %vm95_vm2, %v200_v31  ;;  %v86_v33 = vadd.f32 %v190_v26, %v77_v32 }
 0x146   :  { %v201_v34 = vpack.c.bf16 %v86_v33, %v86_v33 }
 0x148   :  { %97 = vst.msk [vmem:[#allocation2 + $0x4] sm:$0xf] %vm95_vm2, %v201_v34 }
 0x14f   :  { %v222_v35 = vld [vmem:[#allocation2] sm:$0xff]  }
 0x150   :  { %212 = vmatmul.mubr.msk.bf16.vlgmr.msra.gmra.mxu0 %vm41_vm0, %v222_v35 }
 0x210   :  { %v166_v37 = vpop.f32.mrf.mxu0 }
 0x211   :  { %v167_v38 = vadd.f32 %v193_v36, %v166_v37 }
 0x212   :  { %v213_v39 = vpop.f32.mrf.mxu0 }
 0x213   :  { %v202_v40 = vpack.c.bf16 %v167_v38, %v167_v38 }
 0x214   :  { %v169_v41 = vpop.f32.mrf.mxu0 }
 0x215   :  { %182 = vst.msk [vmem:[%s318_s5] sm:$0xf] %vm181_vm3, %v202_v40  ;;  %v170_v42 = vadd.f32 %v193_v36, %v169_v41 }
 0x216   :  { %v214_v43 = vpop.f32.mrf.mxu0 }
 0x217   :  { %v203_v44 = vpack.c.bf16 %v170_v42, %v170_v42 }
 0x219   :  { %183 = vst.msk [vmem:[%s318_s5 + $0x4] sm:$0xf] %vm181_vm3, %v203_v44 }
 0x21a   :  { %188 = vsyncpa [#allocation4], 1 }

// kernel: vector_former_forward.11
= control target key start
LH: loop header
LB: loop body
LE: loop exit
PB: predicated region body
PF: predicated region fallthrough
CT: control target
= control target key end

     0   :  { %vm27_vm0 = vcmask 261120   ;;  %v235_v15 = vmov 0.0   ;;  %vm236_vm1 = vmmov 0   ;;  %vm81_vm2 = vcmask 257024   ;;  %s296_s0 = inlined_call_operand.vmem [shape: f32[16,32], index: 0, kind: input, shape index: {}]   ;;  %s297_s3 = inlined_call_operand.vmem [shape: bf16[32,128], index: 3, kind: input, shape index: {}]   ;;  %s298_s1 = inlined_call_operand.vmem [shape: f32[1,32], index: 1, kind: input, shape index: {}]   ;;  %s299_s2 = inlined_call_operand.vmem [shape: f32[1,32], index: 2, kind: input, shape index: {}]   ;;  %s300_s4 = inlined_call_operand.vmem [shape: f32[1,128], index: 4, kind: input, shape index: {}]   ;;  %s301_s5 = inlined_call_operand.vmem [shape: bf16[16,128], index: 5, kind: output, shape index: {}]  }
   0x1   :  { %v25_v0 = vld [vmem:[%s296_s0] sm:$0xff]  ;;  %v26_v1 = vld [vmem:[%s296_s0 + $0x8] sm:$0xff]  ;;  %214 = vmatprep.subr.bf16.mxu0 %v235_v15  ;;  %218 = vmatprep.mubr.msk.bf16.mxu0 %vm236_vm1, %v235_v15 }
   0x2   :  { %v28_v2 = vsel %vm27_vm0, %v25_v0, 0.0  ;;  %v31_v3 = vsel %vm27_vm0, %v26_v1, 0.0  ;;  %v224_v14 = vld [vmem:[%s297_s3 + $0x8] sm:$0xff]   ;;  %v225_v16 = vld [vmem:[%s297_s3] sm:$0xff]  }
   0x3   :  { %29 = vadd.xlane.f32.xlu0 %v28_v2  ;;  %215 = vmatpush3.bf16.msra.mxu0 %v224_v14  ;;  %v191_v24 = vld [vmem:[%s298_s1] ss:$0 sm:$0xff] }
   0x4   :  { %216 = vmatprep.subr.bf16.mxu0 %v235_v15  ;;  %v192_v26 = vld [vmem:[%s299_s2] ss:$0 sm:$0xff] }
   0x5   :  { %v195_v36 = vld [vmem:[%s300_s4] ss:$0 sm:$0xff] }
   0x7   :  { %32 = vadd.xlane.f32.xlu0 %v31_v3  ;;  %217 = vmatpush3.bf16.msra.mxu0 %v225_v16 }
  0x8c   :  { %v30_v4 = vpop.xlane.xlu0 %29 }
  0x8d   :  { %v35_v5 = vmul.f32 0.03125, %v30_v4 }
  0x8f   :  { %v37_v6 = vsub.f32 %v25_v0, %v35_v5 }
  0x90   :  { %v33_v7 = vpop.xlane.xlu0 %32 }
  0x91   :  { %v36_v8 = vmul.f32 0.03125, %v33_v7  ;;  %v39_v9 = vmul.f32 %v37_v6, %v37_v6 }
  0x93   :  { %v38_v10 = vsub.f32 %v26_v1, %v36_v8  ;;  %v41_v11 = vsel %vm27_vm0, %v39_v9, 0.0 }
  0x94   :  { %42 = vadd.xlane.f32.xlu1 %v41_v11 }
  0x95   :  { %v40_v12 = vmul.f32 %v38_v10, %v38_v10 }
  0x97   :  { %v44_v13 = vsel %vm27_vm0, %v40_v12, 0.0 }
  0x98   :  { %45 = vadd.xlane.f32.xlu1 %v44_v13 }
 0x11d   :  { %v43_v17 = vpop.xlane.xlu1 %42 }
 0x11e   :  { %v47_v18 = vmul.f32 0.03125, %v43_v17 }
 0x120   :  { %v49_v19 = vadd.f32 1e-05, %v47_v18 }
 0x121   :  { %v46_v20 = vpop.xlane.xlu1 %45 }
 0x122   :  { %227 = vrsqrt.f32 %v49_v19  ;;  %v48_v21 = vmul.f32 0.03125, %v46_v20 }
 0x124   :  { %v50_v22 = vadd.f32 1e-05, %v48_v21 }
 0x126   :  { %229 = vrsqrt.f32 %v50_v22 }
 0x12f   :  { %v228_v23 = vpop.eup %227 }
 0x130   :  { %v53_v25 = vmul.f32 %v228_v23, %v37_v6 }
 0x132   :  { %v62_v27 = vmul.f32 %v191_v24, %v53_v25 }
 0x133   :  { %v230_v28 = vpop.eup %229 }
 0x134   :  { %v71_v29 = vadd.f32 %v192_v26, %v62_v27  ;;  %v54_v30 = vmul.f32 %v230_v28, %v38_v10 }
 0x136   :  { %v202_v31 = vpack.c.bf16 %v71_v29, %v71_v29  ;;  %v63_v32 = vmul.f32 %v191_v24, %v54_v30 }
 0x138   :  { %82 = vst.msk [vmem:[#allocation2] sm:$0xf] %vm81_vm2, %v202_v31  ;;  %v72_v33 = vadd.f32 %v192_v26, %v63_v32 }
 0x13a   :  { %v203_v34 = vpack.c.bf16 %v72_v33, %v72_v33 }
 0x13c   :  { %83 = vst.msk [vmem:[#allocation2 + $0x4] sm:$0xf] %vm81_vm2, %v203_v34 }
 0x143   :  { %v226_v35 = vld [vmem:[#allocation2] sm:$0xff]  }
 0x144   :  { %219 = vmatmul.mubr.msk.bf16.vlgmr.msra.gmra.mxu0 %vm27_vm0, %v226_v35 }
 0x204   :  { %v152_v37 = vpop.f32.mrf.mxu0 }
 0x205   :  { %v153_v38 = vadd.f32 %v195_v36, %v152_v37 }
 0x206   :  { %v220_v39 = vpop.f32.mrf.mxu0 }
 0x207   :  { %v159_v40 = vmul.f32 %v153_v38, %v153_v38 }
 0x208   :  { %v155_v41 = vpop.f32.mrf.mxu0 }
 0x209   :  { %v161_v42 = vmul.f32 %v159_v40, %v153_v38  ;;  %v156_v43 = vadd.f32 %v195_v36, %v155_v41 }
 0x20a   :  { %v221_v44 = vpop.f32.mrf.mxu0 }
 0x20b   :  { %v163_v45 = vmul.f32 0.044715, %v161_v42  ;;  %v160_v46 = vmul.f32 %v156_v43, %v156_v43 }
 0x20d   :  { %v165_v47 = vadd.f32 %v163_v45, %v153_v38  ;;  %v162_v48 = vmul.f32 %v160_v46, %v156_v43 }
 0x20f   :  { %v167_v49 = vmul.f32 0.7978846, %v165_v47  ;;  %v164_v50 = vmul.f32 0.044715, %v162_v48 }
 0x211   :  { %231 = vtanh.f32 %v167_v49  ;;  %v166_v51 = vadd.f32 %v164_v50, %v156_v43 }
 0x213   :  { %v168_v52 = vmul.f32 0.7978846, %v166_v51 }
 0x215   :  { %233 = vtanh.f32 %v168_v52 }
 0x21e   :  { %v232_v53 = vpop.eup %231 }
 0x21f   :  { %v171_v54 = vadd.f32 1.0, %v232_v53 }
 0x221   :  { %v173_v56 = vmul.f32 0.5, %v171_v54 }
 0x222   :  { %v234_v55 = vpop.eup %233 }
 0x223   :  { %v172_v57 = vadd.f32 1.0, %v234_v55  ;;  %v175_v59 = vmul.f32 %v173_v56, %v153_v38 }
 0x225   :  { %v174_v58 = vmul.f32 0.5, %v172_v57 }
 0x227   :  { %v176_v60 = vmul.f32 %v174_v58, %v156_v43 }
 0x229   :  { %v209_v61 = vpack.c.bf16 %v176_v60, %v175_v59 }
 0x22b   :  { %210 = vst [vmem:[%s301_s5] sm:$0xff] %v209_v61  }

// kernel: vector_former_forward.12
= control target key start
LH: loop header
LB: loop body
LE: loop exit
PB: predicated region body
PF: predicated region fallthrough
CT: control target
= control target key end

     0   :  { %v210_v0 = vmov 0.0   ;;  %vm211_vm0 = vmmov 0   ;;  %vm33_vm1 = vcmask 261120   ;;  %s295_s1 = inlined_call_operand.vmem [shape: bf16[128,32], index: 1, kind: input, shape index: {}]   ;;  %s296_s2 = inlined_call_operand.vmem [shape: f32[1,32], index: 2, kind: input, shape index: {}]   ;;  %s297_s3 = inlined_call_operand.vmem [shape: f32[16,32], index: 3, kind: input, shape index: {}]   ;;  %s298_s0 = inlined_call_operand.vmem [shape: bf16[16,128], index: 0, kind: input, shape index: {}]   ;;  %s299_s4 = inlined_call_operand.vmem [shape: f32[16,32], index: 4, kind: output, shape index: {}]  }
   0x1   :  { %179 = vmatprep.subr.bf16.mxu0 %v210_v0  ;;  %v201_v1 = vld [vmem:[%s295_s1 + $0x38] sm:$0xff]   ;;  %195 = vmatprep.mubr.msk.bf16.mxu0 %vm211_vm0, %v210_v0  ;;  %v202_v2 = vld [vmem:[%s295_s1 + $0x30] sm:$0xff]   ;;  %v203_v3 = vld [vmem:[%s295_s1 + $0x28] sm:$0xff]  }
   0x2   :  { %180 = vmatpush3.bf16.msra.mxu0 %v201_v1  ;;  %v22_v4 = vld [vmem:[%s297_s3] sm:$0xff]  ;;  %v205_v8 = vld [vmem:[%s295_s1 + $0x18] sm:$0xff]   ;;  %v206_v9 = vld [vmem:[%s295_s1 + $0x10] sm:$0xff]  }
   0x3   :  { %181 = vmatprep.subr.bf16.mxu0 %v210_v0  ;;  %v160_v5 = vld [vmem:[%s296_s2] ss:$0 sm:$0xff]  ;;  %v207_v10 = vld [vmem:[%s295_s1 + $0x8] sm:$0xff]  }
   0x4   :  { %v204_v6 = vld [vmem:[%s295_s1 + $0x20] sm:$0xff]   ;;  %v31_v7 = vadd.f32 %v160_v5, %v22_v4  ;;  %v23_v13 = vld [vmem:[%s297_s3 + $0x8] sm:$0xff] }
   0x5   :  { %v208_v11 = vld [vmem:[%s295_s1] sm:$0xff]   ;;  %v32_v14 = vadd.f32 %v160_v5, %v23_v13 }
   0x6   :  { %182 = vmatpush3.bf16.msra.mxu0 %v202_v2  ;;  %34 = vst.msk [vmem:[%s299_s4] sm:$0xff] %vm33_vm1, %v31_v7  ;;  %v209_v12 = vld [vmem:[%s298_s0] sm:$0xff]  }
   0x7   :  { %183 = vmatprep.subr.bf16.mxu0 %v210_v0  ;;  %35 = vst.msk [vmem:[%s299_s4 + $0x8] sm:$0xff] %vm33_vm1, %v32_v14 }
   0xa   :  { %184 = vmatpush3.bf16.msra.mxu0 %v203_v3 }
   0xb   :  { %185 = vmatprep.subr.bf16.mxu0 %v210_v0 }
   0xd   :  { %v36_v15 = vld [vmem:[%s299_s4] sm:$0xff] }
   0xe   :  { %186 = vmatpush3.bf16.msra.mxu0 %v204_v6  ;;  %v37_v19 = vld [vmem:[%s299_s4 + $0x8] sm:$0xff] }
   0xf   :  { %187 = vmatprep.subr.bf16.mxu0 %v210_v0 }
  0x12   :  { %188 = vmatpush3.bf16.msra.mxu0 %v205_v8 }
  0x13   :  { %189 = vmatprep.subr.bf16.mxu0 %v210_v0 }
  0x16   :  { %190 = vmatpush3.bf16.msra.mxu0 %v206_v9 }
  0x17   :  { %191 = vmatprep.subr.bf16.mxu0 %v210_v0 }
  0x1a   :  { %192 = vmatpush3.bf16.msra.mxu0 %v207_v10 }
  0x1b   :  { %193 = vmatprep.subr.bf16.mxu0 %v210_v0 }
  0x1e   :  { %194 = vmatpush3.bf16.msra.mxu0 %v208_v11 }
  0x21   :  { %196 = vmatmul.mubr.bf16.vlgmr.msra.gmra.mxu0 %v209_v12 }
  0xe1   :  { %v144_v16 = vpop.f32.mrf.mxu0 }
  0xe2   :  { %v151_v17 = vadd.f32 %v144_v16, %v36_v15 }
  0xe3   :  { %v197_v18 = vpop.f32.mrf.mxu0 }
  0xe4   :  { %154 = vst.msk [vmem:[%s299_s4] sm:$0xff] %vm33_vm1, %v151_v17 }
  0xe5   :  { %v147_v20 = vpop.f32.mrf.mxu0 }
  0xe6   :  { %v152_v21 = vadd.f32 %v147_v20, %v37_v19 }
  0xe7   :  { %v198_v22 = vpop.f32.mrf.mxu0 }
  0xe8   :  { %155 = vst.msk [vmem:[%s299_s4 + $0x8] sm:$0xff] %vm33_vm1, %v152_v21 }

// kernel: vector_former_forward.10
= control target key start
LH: loop header
LB: loop body
LE: loop exit
PB: predicated region body
PF: predicated region fallthrough
CT: control target
= control target key end

     0   :  { %s1515_s21 = smov 0   ;;  %s1517_s22 = smov 0   ;;  %s1725_s0 = inlined_call_operand.vmem [shape: bf16[2,8,96], index: 0, kind: input, shape index: {}, may-alias: {0,1,2}]   ;;  %s1726_s1 = inlined_call_operand.vmem [shape: bf16[2,8,96], index: 1, kind: input, shape index: {}, may-alias: {0,1,2}]   ;;  %s1727_s2 = inlined_call_operand.vmem [shape: bf16[2,8,96], index: 2, kind: input, shape index: {}, may-alias: {0,1,2}]   ;;  %s1728_s3 = inlined_call_operand.vmem [shape: bf16[32,32], index: 3, kind: input, shape index: {}]   ;;  %s1729_s4 = inlined_call_operand.vmem [shape: f32[1,32], index: 4, kind: input, shape index: {}]   ;;  %s1730_s5 = inlined_call_operand.vmem [shape: f32[2,8,32], index: 5, kind: input, shape index: {}]   ;;  %s1731_s6 = inlined_call_operand.vmem [shape: f32[2,8,32], index: 6, kind: output, shape index: {}]  }
   0x1   :  { %s1519_s23 = smov 0  }
   0x2 LB: > { %s35_s24 = sadd.s32 1, %s1462_s22  ;;  %p1276_p0 = scmp.ge.s32.totalorder %s1466_s23, 1  ;;  %s1466_s23 = sphi %s1519_s23, %s16_s23   ;;  %s1462_s22 = sphi %s1517_s22, %s1733_s22   ;;  %s1458_s21 = sphi %s1515_s21, %s1732_s21  }
   0x3   : > { %p37_p1 = scmp.ge.s32.totalorder %s35_s24, 2  ;;  %p279_p2 = scmp.lt.s32.totalorder %s1466_s23, 3 }
   0x5   : > { %s1735_s24 = smov (%p37_p1, %s35_s24), 0  ;;  %p280_p3 = pnand %p1276_p0, %p279_p2 }
   0x6   : > { %p334_p4 = scmp.lt.s32.totalorder (!%p280_p3), %s1458_s21, 1  ;;  %s1468_s29 = smov (!%p280_p3), 120  }
   0x7   : > { %283 = sbr.rel (%p280_p3) target bundleno = 1443 (0x5a3), region = 44  ;;  %s1469_s30 = smov (!%p280_p3), 104  }
   0x8   : > { %s1470_s7 = smov (!%p280_p3), 112   ;;  %s1471_s8 = smov (!%p280_p3), 96  }
   0x9   : > { %s1476_s15 = smov (!%p280_p3), 64   ;;  %s1477_s20 = smov (!%p280_p3), 8  }
   0xa   : > { %s1479_s26 = smov (!%p280_p3), 24  }
   0xc   : > { %s1737_s21 = smov (!%p334_p4, %s1458_s21), 1  ;;  %v1472_v9 = vmov 0.0   ;;  %vm383_vm0 = vcmask 64512   ;;  %vm1473_vm1 = vmmov 0   ;;  %vm500_vm2 = vcmask 1043456  }
   0xd   : > { %s1536_s25 = sshll.u32 %s1737_s21, 2  ;;  %1323 = vmatprep.subr.bf16.mxu0 %v1472_v9  ;;  %1329 = vmatprep.subr.bf16.mxu1 %v1472_v9  ;;  %384 = vst.msk [vmem:[#allocation4] sm:$0xff] %vm383_vm0, %v1472_v9  ;;  %385 = vst.msk [vmem:[#allocation4 + $0x8] sm:$0xff] %vm383_vm0, %v1472_v9  ;;  %vm374_vm3 = vcmask 7168   ;;  %v1474_v25 = vmov -inf   ;;  %v1475_v32 = vmov 0  }
   0xe   : > { %s347_s28 = scalar_lea.vmem %s1726_s1, %s1536_s25  ;;  %s340_s11 = scalar_lea.vmem %s1725_s0, %s1536_s25  ;;  %1325 = vmatprep.mubr.msk.bf16.mxu0 %vm1473_vm1, %v1472_v9  ;;  %386 = vst.msk [vmem:[#allocation4 + $0x10] sm:$0xff] %vm383_vm0, %v1472_v9  ;;  %387 = vst.msk [vmem:[#allocation4 + $0x18] sm:$0xff] %vm383_vm0, %v1472_v9  ;;  %1331 = vmatprep.mubr.msk.bf16.mxu1 %vm1473_vm1, %v1472_v9  ;;  %vm1075_vm4 = vcmask 130048   ;;  %vm1077_vm5 = vcmask 195584   ;;  %vm1103_vm6 = vcmask 261120  }
   0xf   : > { %v389_v0 = vld [vmem:[%s347_s28] sm:$0xf]  ;;  %375 = vst.msk [vmem:[#allocation2] sm:$0xff] %vm374_vm3, %v1474_v25  ;;  %376 = vst.msk [vmem:[#allocation2 + $0x8] sm:$0xff] %vm374_vm3, %v1474_v25  ;;  %s354_s14 = scalar_lea.vmem %s1727_s2, %s1536_s25  ;;  %s1478_s25 = smov 16  }
  0x10   : > { %399 = vrot.lane.b32.xlu0 %v389_v0, %s1468_s29  ;;  %403 = vrot.lane.b32.xlu1 %v389_v0, %s1469_s30  ;;  %v1282_v1 = vcombine.low %v389_v0, %v389_v0  ;;  %v388_v8 = vld [vmem:[%s340_s11] sm:$0xf]  ;;  %377 = vst.msk [vmem:[#allocation2 + $0x10] sm:$0xff] %vm374_vm3, %v1474_v25  ;;  %378 = vst.msk [vmem:[#allocation2 + $0x18] sm:$0xff] %vm374_vm3, %v1474_v25  ;;  %s1280_s27 = sshll.u32 %s1737_s21, 3 }
  0x11   : > { %379 = vst.msk [vmem:[#allocation3] sm:$0xff] %vm374_vm3, %v1472_v9  ;;  %380 = vst.msk [vmem:[#allocation3 + $0x8] sm:$0xff] %vm374_vm3, %v1472_v9  ;;  %v390_v51 = vld [vmem:[%s354_s14] sm:$0xf]  ;;  %s368_s11 = scalar_lea.vmem %s1731_s6, %s1280_s27 }
  0x12   : > { %381 = vst.msk [vmem:[#allocation3 + $0x10] sm:$0xff] %vm374_vm3, %v1472_v9  ;;  %382 = vst.msk [vmem:[#allocation3 + $0x18] sm:$0xff] %vm374_vm3, %v1472_v9  ;;  %v1290_v61 = vcombine.low %v390_v51, %v390_v51 }
  0x14   : > { %401 = vrot.lane.b32.xlu0 %v389_v0, %s1470_s7  ;;  %420 = vrot.lane.b32.xlu1 %v1282_v1, %s1471_s8 }
  0x16   : > { %v1621_v52 = vld [vmem:[#allocation2] sm:$0xff]  ;;  %v1631_v56 = vld [vmem:[#allocation2 + $0x8] sm:$0xff] }
  0x17   : > { %v1636_v59 = vld [vmem:[#allocation2 + $0x10] sm:$0xff]  ;;  %v1646_v0 = vld [vmem:[#allocation2 + $0x18] sm:$0xff] }
  0x82   : > { %v400_v2 = vpop.permute.xlu0 %399  ;;  %v404_v3 = vpop.permute.xlu1 %403 }
  0x83   : > { %v1283_v4 = vcombine.low %v400_v2, %v400_v2  ;;  %v1285_v5 = vcombine.low %v404_v3, %v404_v3 }
  0x85   : > { %422 = vrot.lane.b32.xlu0 %v1283_v4, %s1471_s8 }
  0x86   : > { %v402_v6 = vpop.permute.xlu0 %401  ;;  %v421_v10 = vpop.permute.xlu1 %420 }
  0x87   : > { %v1284_v7 = vcombine.low %v402_v6, %v402_v6 }
  0x89   : > { %426 = vrot.lane.b32.xlu0 %v1285_v5, %s1471_s8  ;;  %424 = vrot.lane.b32.xlu1 %v1284_v7, %s1471_s8 }
  0x8d   : > { %394 = vrot.lane.b32.xlu0 %v388_v8, %s1470_s7  ;;  %392 = vrot.lane.b32.xlu1 %v388_v8, %s1468_s29 }
  0x91   : > { %396 = vrot.lane.b32.xlu1 %v388_v8, %s1469_s30 }
  0xab   : > { %432 = vxpose.xlu0.c.b16.start.end [1/1] (short) (narrow) %v421_v10, 16 }
  0xf7   : > { %v423_v11 = vpop.permute.xlu0 %422 }
  0xf8   : > { %448 = vxpose.xlu1.c.b16.start.end [1/1] (short) (narrow) %v423_v11, 16 }
  0xfb   : > { %v425_v12 = vpop.permute.xlu1 %424  ;;  %v427_v13 = vpop.permute.xlu0 %426 }
  0xfc   : > { %464 = vxpose.xlu0.c.b16.start.end [1/1] (short) (narrow) %v425_v12, 16  ;;  %1415 = vset.pattern.permute.xlu1 %v1475_v32 }
  0xff   : > { %v395_v14 = vpop.permute.xlu0 %394  ;;  %v393_v17 = vpop.permute.xlu1 %392 }
 0x100   : > { %480 = vxpose.xlu0.c.b16.start.end [1/1] (short) (narrow) %v427_v13, 16 }
 0x103   : > { %v397_v18 = vpop.permute.xlu1 %396 }
 0x109   : > { %1416 = vset.pattern.permute.xlu0 %v1475_v32 }
 0x10d   : > { %v440_v15 = vpop.trf.xlu0 }
 0x10e   : > { %v502_v16 = vsel %vm500_vm2, %v440_v15, 0 }
 0x10f   : > { %1324 = vmatpush3.bf16.msra.mxu0 %v502_v16 }
 0x110   : > { %1335 = vmatprep.subr.bf16.mxu0 %v1472_v9 }
 0x112   : > { %1326 = vmatmul.mubr.msk.bf16.vlgmr.msra.gmra.mxu0 %vm383_vm0, %v388_v8 }
 0x113   : > { %1337 = vmatprep.mubr.msk.bf16.mxu0 %vm1473_vm1, %v1472_v9 }
 0x15a   : > { %v456_v19 = vpop.trf.xlu1 }
 0x15b   : > { %v548_v20 = vsel %vm500_vm2, %v456_v19, 0 }
 0x15c   : > { %1330 = vmatpush3.bf16.msra.mxu1 %v548_v20 }
 0x15d   : > { %1341 = vmatprep.subr.bf16.mxu1 %v1472_v9 }
 0x15e   : > { %v472_v21 = vpop.trf.xlu0 }
 0x15f   : > { %v594_v22 = vsel %vm500_vm2, %v472_v21, 0  ;;  %1332 = vmatmul.mubr.msk.bf16.vlgmr.msra.gmra.mxu1 %vm383_vm0, %v393_v17 }
 0x160   : > { %1336 = vmatpush3.bf16.msra.mxu0 %v594_v22  ;;  %1343 = vmatprep.mubr.msk.bf16.mxu1 %vm1473_vm1, %v1472_v9 }
 0x161   : > { %1347 = vmatprep.subr.bf16.mxu0 %v1472_v9 }
 0x162   : > { %v488_v23 = vpop.trf.xlu0 }
 0x163   : > { %v640_v24 = vsel %vm500_vm2, %v488_v23, 0  ;;  %1338 = vmatmul.mubr.msk.bf16.vlgmr.msra.gmra.mxu0 %vm383_vm0, %v395_v14 }
 0x164   : > { %1342 = vmatpush3.bf16.msra.mxu1 %v640_v24  ;;  %1349 = vmatprep.mubr.msk.bf16.mxu0 %vm1473_vm1, %v1472_v9 }
 0x165   : > { %1353 = vmatprep.subr.bf16.mxu1 %v1472_v9 }
 0x167   : > { %1344 = vmatmul.mubr.msk.bf16.vlgmr.msra.gmra.mxu1 %vm383_vm0, %v397_v18 }
 0x168   : > { %1355 = vmatprep.mubr.msk.bf16.mxu1 %vm1473_vm1, %v1472_v9 }
 0x1d2   : > { %v538_v26 = vpop.f32.mrf.mxu0 }
 0x1d3   : > { %v1598_v27 = vmul.f32 0.35355338, %v538_v26 }
 0x1d4   : > { %v1327_v28 = vpop.f32.mrf.mxu0 }
 0x1d5   : > { %v690_v29 = vsel %vm383_vm0, %v1598_v27, -inf }
 0x1d6   : > { %691 = vmax.xlane.f32.xlu1 %v690_v29  ;;  %v541_v30 = vpop.f32.mrf.mxu0 }
 0x1d8   : > { %v1328_v31 = vpop.f32.mrf.mxu0 }
 0x21f   : > { %v584_v33 = vpop.f32.mrf.mxu1 }
 0x220   : > { %v1602_v34 = vmul.f32 0.35355338, %v584_v33 }
 0x221   : > { %v1333_v35 = vpop.f32.mrf.mxu1 }
 0x222   : > { %v693_v36 = vsel %vm383_vm0, %v1602_v34, -inf }
 0x223   : > { %v630_v37 = vpop.f32.mrf.mxu0  ;;  %694 = vmax.xlane.f32.xlu0 %v693_v36  ;;  %v587_v38 = vpop.f32.mrf.mxu1 }
 0x224   : > { %v1606_v39 = vmul.f32 0.35355338, %v630_v37 }
 0x225   : > { %v1334_v40 = vpop.f32.mrf.mxu1  ;;  %v1339_v41 = vpop.f32.mrf.mxu0 }
 0x226   : > { %v696_v42 = vsel %vm383_vm0, %v1606_v39, -inf }
 0x227   : > { %v633_v43 = vpop.f32.mrf.mxu0  ;;  %697 = vmax.xlane.f32.xlu1 %v696_v42  ;;  %v676_v44 = vpop.f32.mrf.mxu1 }
 0x228   : > { %v1610_v45 = vmul.f32 0.35355338, %v676_v44 }
 0x229   : > { %v1340_v46 = vpop.f32.mrf.mxu0  ;;  %v1345_v47 = vpop.f32.mrf.mxu1 }
 0x22a   : > { %v699_v48 = vsel %vm383_vm0, %v1610_v45, -inf }
 0x22b   : > { %700 = vmax.xlane.f32.xlu0 %v699_v48  ;;  %v679_v49 = vpop.f32.mrf.mxu1 }
 0x22d   : > { %v1346_v50 = vpop.f32.mrf.mxu1 }
 0x238   : > { %406 = vrot.lane.b32.xlu1 %v390_v51, %s1468_s29 }
 0x23c   : > { %410 = vrot.lane.b32.xlu1 %v390_v51, %s1469_s30  ;;  %s361_s30 = scalar_lea.vmem %s1730_s5, %s1280_s27 }
 0x241   : > { %408 = vrot.lane.b32.xlu0 %v390_v51, %s1470_s7  ;;  %v751_v51 = vld [vmem:[#allocation3 + $0x8] sm:$0xff] }
 0x25f   : > { %v692_v53 = vpop.xlane.xlu1 %691 }
 0x260   : > { %v1624_v54 = vmax.f32 %v1621_v52, %v692_v53 }
 0x262   : > { %v706_v55 = vsub.f32 %v1621_v52, %v1624_v54  ;;  %1019 = vst.msk [vmem:[#allocation2] sm:$0xff] %vm374_vm3, %v1624_v54  ;;  %720 = vperm.xlu1 %1415, %v1624_v54  }
 0x264   : > { %v710_v50 = vmul.f32 1.442695, %v706_v55 }
 0x2ac   : > { %v695_v57 = vpop.xlane.xlu0 %694 }
 0x2ad   : > { %v1634_v58 = vmax.f32 %v1631_v56, %v695_v57  ;;  %v752_v57 = vld [vmem:[#allocation3 + $0x10] sm:$0xff] }
 0x2af   : > { %v707_v60 = vsub.f32 %v1631_v56, %v1634_v58  ;;  %1020 = vst.msk [vmem:[#allocation2 + $0x8] sm:$0xff] %vm374_vm3, %v1634_v58  ;;  %725 = vperm.xlu0 %1416, %v1634_v58  }
 0x2b0   : > { %v698_v62 = vpop.xlane.xlu1 %697 }
 0x2b1   : > { %v1644_v63 = vmax.f32 %v1636_v59, %v698_v62  ;;  %v712_v38 = vmul.f32 1.442695, %v707_v60 }
 0x2b3   : > { %v708_v1 = vsub.f32 %v1636_v59, %v1644_v63  ;;  %1021 = vst.msk [vmem:[#allocation2 + $0x10] sm:$0xff] %vm374_vm3, %v1644_v63  ;;  %730 = vperm.xlu1 %1415, %v1644_v63   ;;  %813 = vrot.lane.b32.xlu0 %v1290_v61, %s1476_s15  ;;  %v753_v61 = vld [vmem:[#allocation3 + $0x18] sm:$0xff] }
 0x2b4   : > { %v701_v2 = vpop.xlane.xlu0 %700  ;;  %v407_v3 = vpop.permute.xlu1 %406 }
 0x2b5   : > { %v705_v4 = vmax.f32 %v1646_v0, %v701_v2  ;;  %v1292_v6 = vcombine.low %v407_v3, %v407_v3  ;;  %v714_v46 = vmul.f32 1.442695, %v708_v1  ;;  %v750_v2 = vld [vmem:[#allocation3] sm:$0xff] }
 0x2b7   : > { %v709_v5 = vsub.f32 %v1646_v0, %v705_v4  ;;  %1022 = vst.msk [vmem:[#allocation2 + $0x18] sm:$0xff] %vm374_vm3, %v705_v4  ;;  %735 = vperm.xlu1 %1415, %v705_v4  }
 0x2b8   : > { %v409_v7 = vpop.permute.xlu0 %408  ;;  %v411_v8 = vpop.permute.xlu1 %410 }
 0x2b9   : > { %v1294_v10 = vcombine.low %v409_v7, %v409_v7  ;;  %v1296_v11 = vcombine.low %v411_v8, %v411_v8  ;;  %v716_v42 = vmul.f32 1.442695, %v709_v5 }
 0x2bb   : > { %863 = vrot.lane.b32.xlu1 %v1292_v6, %s1476_s15  ;;  %913 = vrot.lane.b32.xlu0 %v1294_v10, %s1476_s15 }
 0x2bf   : > { %963 = vrot.lane.b32.xlu1 %v1296_v11, %s1476_s15 }
 0x2dd   : > { %v721_v12 = vpop.permute.xlu1 %720 }
 0x2de   : > { %v738_v13 = vsub.f32 %v1598_v27, %v721_v12 }
 0x2e0   : > { %v742_v14 = vmul.f32 1.442695, %v738_v13 }
 0x2e2   : > { %1420 = vpow2.f32 %v742_v14 }
 0x2ef   : > { %v1421_v18 = vpop.eup %1420 }
 0x2f0   : > { %v807_v24 = vpack.c.bf16 %v1421_v18, %v1421_v18 }
 0x32a   : > { %v726_v15 = vpop.permute.xlu0 %725 }
 0x32b   : > { %v739_v16 = vsub.f32 %v1602_v34, %v726_v15 }
 0x32d   : > { %v744_v17 = vmul.f32 1.442695, %v739_v16 }
 0x32e   : > { %v814_v19 = vpop.permute.xlu0 %813  ;;  %v731_v20 = vpop.permute.xlu1 %730 }
 0x32f   : > { %1422 = vpow2.f32 %v744_v17  ;;  %v819_v21 = vsel %vm500_vm2, %v814_v19, 0  ;;  %v740_v22 = vsub.f32 %v1606_v39, %v731_v20  ;;  %v780_v17 = vld [vmem:[#allocation4 + $0x8] sm:$0xff]  ;;  %v781_v20 = vld [vmem:[#allocation4 + $0x10] sm:$0xff] }
 0x330   : > { %1348 = vmatpush3.bf16.msra.mxu0 %v819_v21 }
 0x331   : > { %v746_v23 = vmul.f32 1.442695, %v740_v22  ;;  %1359 = vmatprep.subr.bf16.mxu0 %v1472_v9 }
 0x332   : > { %v736_v25 = vpop.permute.xlu1 %735  ;;  %v914_v26 = vpop.permute.xlu0 %913 }
 0x333   : > { %1424 = vpow2.f32 %v746_v23  ;;  %v741_v27 = vsub.f32 %v1610_v45, %v736_v25  ;;  %1350 = vmatmul.mubr.msk.bf16.vlgmr.msra.gmra.mxu0 %vm383_vm0, %v807_v24  ;;  %v919_v28 = vsel %vm500_vm2, %v914_v26, 0  ;;  %v758_v45 = vsel %vm383_vm0, %v1421_v18, 0.0 }
 0x334   : > { %1360 = vmatpush3.bf16.msra.mxu0 %v919_v28  ;;  %1361 = vmatprep.mubr.msk.bf16.mxu0 %vm1473_vm1, %v1472_v9 }
 0x335   : > { %v748_v29 = vmul.f32 1.442695, %v741_v27  ;;  %1371 = vmatprep.subr.bf16.mxu0 %v1472_v9  ;;  %v782_v27 = vld [vmem:[#allocation4 + $0x18] sm:$0xff] }
 0x336   : > { %v864_v30 = vpop.permute.xlu1 %863 }
 0x337   : > { %1426 = vpow2.f32 %v748_v29  ;;  %v869_v31 = vsel %vm500_vm2, %v864_v30, 0 }
 0x338   : > { %1354 = vmatpush3.bf16.msra.mxu1 %v869_v31  ;;  %1428 = vpow2.f32 %v712_v38 }
 0x339   : > { %1365 = vmatprep.subr.bf16.mxu1 %v1472_v9  ;;  %1430 = vpow2.f32 %v716_v42  ;;  %v1419_v42 = vld [vmem:[%s1728_s3] sm:$0xff]  }
 0x33a   : > { %v964_v32 = vpop.permute.xlu1 %963  ;;  %1432 = vpow2.f32 %v714_v46 }
 0x33b   : > { %v969_v36 = vsel %vm500_vm2, %v964_v32, 0  ;;  %1434 = vpow2.f32 %v710_v50 }
 0x33c   : > { %v1423_v33 = vpop.eup %1422 }
 0x33d   : > { %v761_v34 = vsel %vm383_vm0, %v1423_v33, 0.0  ;;  %v808_v35 = vpack.c.bf16 %v1423_v33, %v1423_v33 }
 0x33e   : > { %762 = vadd.xlane.f32.xlu0 %v761_v34 }
 0x33f   : > { %1356 = vmatmul.mubr.msk.bf16.vlgmr.msra.gmra.mxu1 %vm383_vm0, %v808_v35 }
 0x340   : > { %v1425_v37 = vpop.eup %1424  ;;  %1366 = vmatpush3.bf16.msra.mxu1 %v969_v36  ;;  %1367 = vmatprep.mubr.msk.bf16.mxu1 %vm1473_vm1, %v1472_v9 }
 0x341   : > { %v764_v39 = vsel %vm383_vm0, %v1425_v37, 0.0  ;;  %v809_v40 = vpack.c.bf16 %v1425_v37, %v1425_v37 }
 0x342   : > { %765 = vadd.xlane.f32.xlu1 %v764_v39 }
 0x343   : > { %1362 = vmatmul.mubr.msk.bf16.vlgmr.msra.gmra.mxu0 %vm383_vm0, %v809_v40 }
 0x344   : > { %v1427_v41 = vpop.eup %1426  ;;  %1375 = vmatprep.mubr.msk.bf16.mxu0 %vm1473_vm1, %v1472_v9 }
 0x345   : > { %v767_v43 = vsel %vm383_vm0, %v1427_v41, 0.0  ;;  %v810_v44 = vpack.c.bf16 %v1427_v41, %v1427_v41  ;;  %v1429_v47 = vpop.eup %1428  ;;  %v1418_v41 = vld [vmem:[%s1728_s3 + $0x8] sm:$0xff]  }
 0x346   : > { %768 = vadd.xlane.f32.xlu0 %v767_v43  ;;  %v1431_v48 = vpop.eup %1430  ;;  %v755_v53 = vmul.f32 %v1429_v47, %v751_v51  ;;  %1372 = vmatpush3.bf16.msra.mxu0 %v1418_v41 }
 0x347   : > { %1368 = vmatmul.mubr.msk.bf16.vlgmr.msra.gmra.mxu1 %vm383_vm0, %v810_v44  ;;  %v1433_v49 = vpop.eup %1432  ;;  %v757_v63 = vmul.f32 %v1431_v48, %v753_v61  ;;  %1373 = vmatprep.subr.bf16.mxu0 %v1472_v9 }
 0x348   : > { %v756_v59 = vmul.f32 %v1433_v49, %v752_v57  ;;  %v1435_v0 = vpop.eup %1434 }
 0x349   : > { %v754_v55 = vmul.f32 %v1435_v0, %v750_v2 }
 0x34a   : > { %759 = vadd.xlane.f32.xlu0 %v758_v45  ;;  %1374 = vmatpush3.bf16.msra.mxu0 %v1419_v42 }
 0x353   : > { %790 = vperm.xlu1 %1415, %v1429_v47  }
 0x357   : > { %800 = vperm.xlu1 %1415, %v1431_v48  }
 0x360   : > { %795 = vperm.xlu0 %1416, %v1433_v49   ;;  %v779_v49 = vld [vmem:[#allocation4] sm:$0xff] }
 0x3c7   : > { %v763_v56 = vpop.xlane.xlu0 %762 }
 0x3c8   : > { %v771_v58 = vadd.f32 %v763_v56, %v755_v53 }
 0x3ca   : > { %776 = vst.msk [vmem:[#allocation3 + $0x8] sm:$0xff] %vm374_vm3, %v771_v58 }
 0x3cb   : > { %v766_v60 = vpop.xlane.xlu1 %765 }
 0x3cc   : > { %v772_v62 = vadd.f32 %v766_v60, %v756_v59 }
 0x3ce   : > { %777 = vst.msk [vmem:[#allocation3 + $0x10] sm:$0xff] %vm374_vm3, %v772_v62 }
 0x3cf   : > { %v769_v1 = vpop.xlane.xlu0 %768  ;;  %v791_v18 = vpop.permute.xlu1 %790 }
 0x3d0   : > { %v773_v52 = vadd.f32 %v769_v1, %v757_v63  ;;  %v804_v19 = vmul.f32 %v791_v18, %v780_v17 }
 0x3d1   : > { %v1031_v54 = vld [vmem:[#allocation3 + $0x8] sm:$0xff] }
 0x3d2   : > { %778 = vst.msk [vmem:[#allocation3 + $0x18] sm:$0xff] %vm374_vm3, %v773_v52  ;;  %1436 = vrcp.f32 %v1031_v54  ;;  %v1298_v54 = vld [vmem:[%s1729_s4] ss:$0 sm:$0xff] }
 0x3d3   : > { %v760_v3 = vpop.xlane.xlu0 %759  ;;  %v801_v25 = vpop.permute.xlu1 %800 }
 0x3d4   : > { %v770_v4 = vadd.f32 %v760_v3, %v754_v55  ;;  %v806_v33 = vmul.f32 %v801_v25, %v782_v27  ;;  %v1147_v3 = vld [vmem:[%s361_s30] sm:$0xff] }
 0x3d5   : > { %v1032_v5 = vld [vmem:[#allocation3 + $0x10] sm:$0xff] }
 0x3d6   : > { %775 = vst.msk [vmem:[#allocation3] sm:$0xff] %vm374_vm3, %v770_v4  ;;  %1438 = vrcp.f32 %v1032_v5 }
 0x3d9   : > { %v1033_v6 = vld [vmem:[#allocation3 + $0x18] sm:$0xff] }
 0x3da   : > { %1440 = vrcp.f32 %v1033_v6 }
 0x3db   : > { %v796_v21 = vpop.permute.xlu0 %795 }
 0x3dc   : > { %v805_v26 = vmul.f32 %v796_v21, %v781_v20 }
 0x3dd   : > { %v1030_v7 = vld [vmem:[#allocation3] sm:$0xff] }
 0x3de   : > { %1442 = vrcp.f32 %v1030_v7 }
 0x3df   : > { %v1437_v8 = vpop.eup %1436 }
 0x3e0   : > { %1045 = vperm.xlu1 %1415, %v1437_v8  }
 0x3e3   : > { %v1439_v10 = vpop.eup %1438 }
 0x3e4   : > { %1050 = vperm.xlu0 %1416, %v1439_v10  }
 0x3e7   : > { %v1441_v11 = vpop.eup %1440 }
 0x3e8   : > { %1055 = vperm.xlu1 %1415, %v1441_v11   ;;  %785 = vperm.xlu0 %1416, %v1435_v0  }
 0x3eb   : > { %v1443_v12 = vpop.eup %1442 }
 0x3ec   : > { %1040 = vperm.xlu1 %1415, %v1443_v12  }
 0x3f3   : > { %v855_v13 = vpop.f32.mrf.mxu0 }
 0x3f5   : > { %v1351_v14 = vpop.f32.mrf.mxu0 }
 0x3f7   : > { %v858_v15 = vpop.f32.mrf.mxu0 }
 0x3f9   : > { %v1352_v16 = vpop.f32.mrf.mxu0 }
 0x3ff   : > { %v905_v22 = vpop.f32.mrf.mxu1 }
 0x400   : > { %v1012_v23 = vadd.f32 %v905_v22, %v804_v19 }
 0x401   : > { %v1357_v24 = vpop.f32.mrf.mxu1 }
 0x402   : > { %1016 = vst.msk [vmem:[#allocation4 + $0x8] sm:$0xff] %vm383_vm0, %v1012_v23 }
 0x403   : > { %v908_v28 = vpop.f32.mrf.mxu1  ;;  %v955_v29 = vpop.f32.mrf.mxu0 }
 0x404   : > { %v1013_v30 = vadd.f32 %v955_v29, %v805_v26 }
 0x405   : > { %v1358_v31 = vpop.f32.mrf.mxu1  ;;  %v1363_v32 = vpop.f32.mrf.mxu0 }
 0x406   : > { %1017 = vst.msk [vmem:[#allocation4 + $0x10] sm:$0xff] %vm383_vm0, %v1013_v30 }
 0x407   : > { %v958_v34 = vpop.f32.mrf.mxu0  ;;  %v1005_v35 = vpop.f32.mrf.mxu1 }
 0x408   : > { %v1014_v36 = vadd.f32 %v1005_v35, %v806_v33 }
 0x409   : > { %v1364_v37 = vpop.f32.mrf.mxu0  ;;  %v1369_v38 = vpop.f32.mrf.mxu1  ;;  %v1027_v43 = vld [vmem:[#allocation4 + $0x8] sm:$0xff] }
 0x40a   : > { %1018 = vst.msk [vmem:[#allocation4 + $0x18] sm:$0xff] %vm383_vm0, %v1014_v36 }
 0x40b   : > { %v1008_v39 = vpop.f32.mrf.mxu1 }
 0x40d   : > { %v1370_v40 = vpop.f32.mrf.mxu1  ;;  %v1028_v46 = vld [vmem:[#allocation4 + $0x10] sm:$0xff] }
 0x411   : > { %v1029_v51 = vld [vmem:[#allocation4 + $0x18] sm:$0xff] }
 0x45b   : > { %v1046_v44 = vpop.permute.xlu1 %1045 }
 0x45c   : > { %v1059_v45 = vmul.f32 %v1046_v44, %v1027_v43 }
 0x45e   : > { %1063 = vrot.lane.b32.xlu0 %v1059_v45, %s1477_s20 }
 0x45f   : > { %v1051_v47 = vpop.permute.xlu0 %1050 }
 0x460   : > { %v1060_v48 = vmul.f32 %v1051_v47, %v1028_v46 }
 0x462   : > { %1067 = vrot.lane.b32.xlu1 %v1060_v48, %s1478_s25 }
 0x463   : > { %v786_v50 = vpop.permute.xlu0 %785  ;;  %v1056_v53 = vpop.permute.xlu1 %1055 }
 0x464   : > { %v803_v9 = vmul.f32 %v786_v50, %v779_v49  ;;  %v1061_v56 = vmul.f32 %v1056_v53, %v1029_v51 }
 0x466   : > { %v1011_v57 = vadd.f32 %v855_v13, %v803_v9  ;;  %1071 = vrot.lane.b32.xlu0 %v1061_v56, %s1479_s26 }
 0x467   : > { %v1041_v58 = vpop.permute.xlu1 %1040 }
 0x468   : > { %1015 = vst.msk [vmem:[#allocation4] sm:$0xff] %vm383_vm0, %v1011_v57 }
 0x46f   : > { %v1026_v59 = vld [vmem:[#allocation4] sm:$0xff] }
 0x470   : > { %v1058_v61 = vmul.f32 %v1041_v58, %v1026_v59 }
 0x4d0   : > { %v1064_v60 = vpop.permute.xlu0 %1063 }
 0x4d1   : > { %v1074_v63 = vsel %vm383_vm0, %v1058_v61, %v1064_v60 }
 0x4d4   : > { %v1068_v62 = vpop.permute.xlu1 %1067 }
 0x4d5   : > { %v1076_v0 = vsel %vm1075_vm4, %v1074_v63, %v1068_v62 }
 0x4d8   : > { %v1072_v1 = vpop.permute.xlu0 %1071 }
 0x4d9   : > { %v1078_v2 = vsel %vm1077_vm5, %v1076_v0, %v1072_v1 }
 0x4da   : > { %v1079_v52 = vpack.c.bf16 %v1078_v2, %v1078_v2 }
 0x4dc   : > { %1376 = vmatmul.mubr.msk.bf16.vlgmr.msra.gmra.mxu0 %vm1103_vm6, %v1079_v52 }
 0x59c   : > { %v1141_v55 = vpop.f32.mrf.mxu0 }
 0x59d   : > { %v1142_v4 = vadd.f32 %v1298_v54, %v1141_v55 }
 0x59e   : > { %v1377_v5 = vpop.f32.mrf.mxu0 }
 0x59f   : > { %v1148_v6 = vadd.f32 %v1147_v3, %v1142_v4 }
 0x5a0   : > { %v1144_v7 = vpop.f32.mrf.mxu0 }
 0x5a1   : > { %1149 = vst.msk [vmem:[%s368_s11] sm:$0xff] %vm1103_vm6, %v1148_v6 }
 0x5a2   : > { %v1378_v8 = vpop.f32.mrf.mxu0 }
 0x5a3 PF: > { %s16_s23 = sadd.s32 1, %s1466_s23   ;;  %s1732_s21 = smov %s1462_s22 }
 0x5a4   : > { %p13_p5 = scmp.ge.s32.totalorder %s16_s23, 4   ;;  %s1733_s22 = smov %s1735_s24 }
 0x5a6   :  { %15 = sbr.rel (!%p13_p5) target bundleno = 2 (0x2), region = 91 }

// kernel: vector_former_forward.17
= control target key start
LH: loop header
LB: loop body
LE: loop exit
PB: predicated region body
PF: predicated region fallthrough
CT: control target
= control target key end

     0   :  { %vm17_vm0 = vcmask 261120   ;;  %s156_s0 = inlined_call_operand.vmem [shape: f32[16,32], index: 0, kind: input, shape index: {}]   ;;  %s157_s1 = inlined_call_operand.vmem [shape: f32[1,32], index: 1, kind: input, shape index: {}]   ;;  %s158_s2 = inlined_call_operand.vmem [shape: f32[1,32], index: 2, kind: input, shape index: {}]   ;;  %s159_s3 = inlined_call_operand.hbm [shape: f32[16,32], index: 3, kind: output, shape index: {}]  }
   0x1   :  { %v15_v0 = vld [vmem:[%s156_s0] sm:$0xff]  ;;  %v16_v1 = vld [vmem:[%s156_s0 + $0x8] sm:$0xff] }
   0x2   :  { %8 = vsyncpa [#allocation3], 0  ;;  %v18_v2 = vsel %vm17_vm0, %v15_v0, 0.0  ;;  %v21_v3 = vsel %vm17_vm0, %v16_v1, 0.0  ;;  %v81_v21 = vld [vmem:[%s157_s1] ss:$0 sm:$0xff] }
   0x3   :  { %19 = vadd.xlane.f32.xlu0 %v18_v2  ;;  %v82_v23 = vld [vmem:[%s158_s2] ss:$0 sm:$0xff]  ;;  %s112_s19 = smov [#allocation2]  }
   0x4   :  { %s70_s20 = sshll.u32 %s112_s19, 4  ;;  %s71_s20 = int_to_ptr.vmem [resolvable:$true] %s70_s20 }
   0x5   :  { %s90_s21 = scalar_lea.vmem %s71_s20, 256  ;;  %p95_p1 = scmp.lt.s32.totalorder %s71_s20, %s71_s20 }
   0x6   :  { %p91_p0 = scmp.ne.s32.totalorder %s71_s20, %s90_s21  ;;  %p96_p2 = scmp.lt.s32.totalorder %s90_s21, %s90_s21 }
   0x7   :  { %22 = vadd.xlane.f32.xlu0 %v21_v3 }
   0x8   :  { %p97_p3 = por %p96_p2, %p95_p1 }
   0xa   :  { %p98_p4 = pnand %p97_p3, %p91_p0 }
  0x8c   :  { %v20_v4 = vpop.xlane.xlu0 %19 }
  0x8d   :  { %v25_v5 = vmul.f32 0.03125, %v20_v4 }
  0x8f   :  { %v27_v6 = vsub.f32 %v15_v0, %v25_v5 }
  0x90   :  { %v23_v7 = vpop.xlane.xlu0 %22 }
  0x91   :  { %v26_v8 = vmul.f32 0.03125, %v23_v7  ;;  %v29_v9 = vmul.f32 %v27_v6, %v27_v6 }
  0x93   :  { %v28_v10 = vsub.f32 %v16_v1, %v26_v8  ;;  %v31_v11 = vsel %vm17_vm0, %v29_v9, 0.0 }
  0x94   :  { %32 = vadd.xlane.f32.xlu1 %v31_v11 }
  0x95   :  { %v30_v12 = vmul.f32 %v28_v10, %v28_v10 }
  0x97   :  { %v34_v13 = vsel %vm17_vm0, %v30_v12, 0.0 }
  0x98   :  { %35 = vadd.xlane.f32.xlu1 %v34_v13 }
 0x11d   :  { %v33_v14 = vpop.xlane.xlu1 %32 }
 0x11e   :  { %v37_v15 = vmul.f32 0.03125, %v33_v14 }
 0x120   :  { %v39_v16 = vadd.f32 1e-05, %v37_v15 }
 0x121   :  { %v36_v17 = vpop.xlane.xlu1 %35 }
 0x122   :  { %86 = vrsqrt.f32 %v39_v16  ;;  %v38_v18 = vmul.f32 0.03125, %v36_v17 }
 0x124   :  { %v40_v19 = vadd.f32 1e-05, %v38_v18 }
 0x126   :  { %88 = vrsqrt.f32 %v40_v19 }
 0x12f   :  { %v87_v20 = vpop.eup %86 }
 0x130   :  { %v43_v22 = vmul.f32 %v87_v20, %v27_v6 }
 0x132   :  { %v52_v24 = vmul.f32 %v81_v21, %v43_v22 }
 0x133   :  { %v89_v25 = vpop.eup %88 }
 0x134   :  { %v44_v26 = vmul.f32 %v89_v25, %v28_v10  ;;  %v61_v27 = vadd.f32 %v82_v23, %v52_v24 }
 0x136   :  { %v53_v28 = vmul.f32 %v81_v21, %v44_v26  ;;  %63 = vst.msk [vmem:[#allocation2] sm:$0xff] %vm17_vm0, %v61_v27 }
 0x138   :  { %v62_v29 = vadd.f32 %v82_v23, %v53_v28 }
 0x13a   :  { %64 = vst.msk [vmem:[#allocation2 + $0x8] sm:$0xff] %vm17_vm0, %v62_v29 }
 0x13b   :  { %101 = shalt.err (!%p98_p4)
}
 0x13c   :  { %s113_s1 = smov 128   ;;  %s114_s2 = smov 8  }
 0x13d   :  { %76 = dma.vmem_to_hbm [thread:$0]  %s71_s20, 256, %s159_s3, [#allocation3], %s113_s1, %s113_s1, %s114_s2  }
 0x13e   :  { %110 = dma.done.wait [#allocation3], 256  }
 0x13f   :  { %111 = vsyncadd [#allocation3], 4294967040 }
 0x140   :  { %80 = vsyncpa [#allocation3], 1 }

// kernel: vector_former_forward.13
= control target key start
LH: loop header
LB: loop body
LE: loop exit
PB: predicated region body
PF: predicated region fallthrough
CT: control target
= control target key end

     0   :  { %vm27_vm0 = vcmask 261120   ;;  %v209_v15 = vmov 0.0   ;;  %vm210_vm1 = vmmov 0   ;;  %vm81_vm2 = vcmask 257024   ;;  %s273_s0 = inlined_call_operand.vmem [shape: f32[16,32], index: 0, kind: input, shape index: {}]   ;;  %s274_s3 = inlined_call_operand.vmem [shape: bf16[32,96], index: 3, kind: input, shape index: {}]   ;;  %s275_s1 = inlined_call_operand.vmem [shape: f32[1,32], index: 1, kind: input, shape index: {}]   ;;  %s276_s2 = inlined_call_operand.vmem [shape: f32[1,32], index: 2, kind: input, shape index: {}]   ;;  %s277_s4 = inlined_call_operand.vmem [shape: f32[1,96], index: 4, kind: input, shape index: {}]   ;;  %s278_s5 = inlined_call_operand.vmem [shape: bf16[16,96], index: 5, kind: output, shape index: {}]  }
   0x1   :  { %v25_v0 = vld [vmem:[%s273_s0] sm:$0xff]  ;;  %v26_v1 = vld [vmem:[%s273_s0 + $0x8] sm:$0xff]  ;;  %192 = vmatprep.subr.bf16.mxu0 %v209_v15  ;;  %196 = vmatprep.mubr.msk.bf16.mxu0 %vm210_vm1, %v209_v15  ;;  %vm167_vm3 = vcmask 781312  }
   0x2   :  { %v28_v2 = vsel %vm27_vm0, %v25_v0, 0.0  ;;  %v31_v3 = vsel %vm27_vm0, %v26_v1, 0.0  ;;  %v202_v14 = vld [vmem:[%s274_s3 + $0x8] sm:$0xff]   ;;  %v203_v16 = vld [vmem:[%s274_s3] sm:$0xff]  }
   0x3   :  { %29 = vadd.xlane.f32.xlu0 %v28_v2  ;;  %193 = vmatpush3.bf16.msra.mxu0 %v202_v14  ;;  %v174_v24 = vld [vmem:[%s275_s1] ss:$0 sm:$0xff] }
   0x4   :  { %194 = vmatprep.subr.bf16.mxu0 %v209_v15  ;;  %v175_v26 = vld [vmem:[%s276_s2] ss:$0 sm:$0xff] }
   0x5   :  { %v178_v36 = vld [vmem:[%s277_s4] ss:$0 sm:$0xff] }
   0x7   :  { %32 = vadd.xlane.f32.xlu0 %v31_v3  ;;  %195 = vmatpush3.bf16.msra.mxu0 %v203_v16 }
  0x8c   :  { %v30_v4 = vpop.xlane.xlu0 %29 }
  0x8d   :  { %v35_v5 = vmul.f32 0.03125, %v30_v4 }
  0x8f   :  { %v37_v6 = vsub.f32 %v25_v0, %v35_v5 }
  0x90   :  { %v33_v7 = vpop.xlane.xlu0 %32 }
  0x91   :  { %v36_v8 = vmul.f32 0.03125, %v33_v7  ;;  %v39_v9 = vmul.f32 %v37_v6, %v37_v6 }
  0x93   :  { %v38_v10 = vsub.f32 %v26_v1, %v36_v8  ;;  %v41_v11 = vsel %vm27_vm0, %v39_v9, 0.0 }
  0x94   :  { %42 = vadd.xlane.f32.xlu1 %v41_v11 }
  0x95   :  { %v40_v12 = vmul.f32 %v38_v10, %v38_v10 }
  0x97   :  { %v44_v13 = vsel %vm27_vm0, %v40_v12, 0.0 }
  0x98   :  { %45 = vadd.xlane.f32.xlu1 %v44_v13 }
 0x11d   :  { %v43_v17 = vpop.xlane.xlu1 %42 }
 0x11e   :  { %v47_v18 = vmul.f32 0.03125, %v43_v17 }
 0x120   :  { %v49_v19 = vadd.f32 1e-05, %v47_v18 }
 0x121   :  { %v46_v20 = vpop.xlane.xlu1 %45 }
 0x122   :  { %205 = vrsqrt.f32 %v49_v19  ;;  %v48_v21 = vmul.f32 0.03125, %v46_v20 }
 0x124   :  { %v50_v22 = vadd.f32 1e-05, %v48_v21 }
 0x126   :  { %207 = vrsqrt.f32 %v50_v22 }
 0x12f   :  { %v206_v23 = vpop.eup %205 }
 0x130   :  { %v53_v25 = vmul.f32 %v206_v23, %v37_v6 }
 0x132   :  { %v62_v27 = vmul.f32 %v174_v24, %v53_v25 }
 0x133   :  { %v208_v28 = vpop.eup %207 }
 0x134   :  { %v71_v29 = vadd.f32 %v175_v26, %v62_v27  ;;  %v54_v30 = vmul.f32 %v208_v28, %v38_v10 }
 0x136   :  { %v185_v31 = vpack.c.bf16 %v71_v29, %v71_v29  ;;  %v63_v32 = vmul.f32 %v174_v24, %v54_v30 }
 0x138   :  { %82 = vst.msk [vmem:[#allocation2] sm:$0xf] %vm81_vm2, %v185_v31  ;;  %v72_v33 = vadd.f32 %v175_v26, %v63_v32 }
 0x13a   :  { %v186_v34 = vpack.c.bf16 %v72_v33, %v72_v33 }
 0x13c   :  { %83 = vst.msk [vmem:[#allocation2 + $0x4] sm:$0xf] %vm81_vm2, %v186_v34 }
 0x143   :  { %v204_v35 = vld [vmem:[#allocation2] sm:$0xff]  }
 0x144   :  { %197 = vmatmul.mubr.msk.bf16.vlgmr.msra.gmra.mxu0 %vm27_vm0, %v204_v35 }
 0x204   :  { %v152_v37 = vpop.f32.mrf.mxu0 }
 0x205   :  { %v153_v38 = vadd.f32 %v178_v36, %v152_v37 }
 0x206   :  { %v198_v39 = vpop.f32.mrf.mxu0 }
 0x207   :  { %v187_v40 = vpack.c.bf16 %v153_v38, %v153_v38 }
 0x208   :  { %v155_v41 = vpop.f32.mrf.mxu0 }
 0x209   :  { %168 = vst.msk [vmem:[%s278_s5] sm:$0xf] %vm167_vm3, %v187_v40  ;;  %v156_v42 = vadd.f32 %v178_v36, %v155_v41 }
 0x20a   :  { %v199_v43 = vpop.f32.mrf.mxu0 }
 0x20b   :  { %v188_v44 = vpack.c.bf16 %v156_v42, %v156_v42 }
 0x20d   :  { %169 = vst.msk [vmem:[%s278_s5 + $0x4] sm:$0xf] %vm167_vm3, %v188_v44 }

</bundles_post_ra>
